<compile_context>
chip_gen: v7x
topology: tpu7x:2x2x1
jax: 0.10.0
libtpu: 0.0.40
codegen_flags: <defaults>
</compile_context>

<pallas_src>
import functools

import jax
import jax.numpy as jnp
import numpy as np
from jax import lax
from jax.experimental import pallas as pl
from jax.experimental.pallas import tpu as pltpu

EPS = 1e-5


# ---------------------------------------------------------------------------
# Hardware-aware knobs (safe fallbacks everywhere).
# ---------------------------------------------------------------------------
def _device_kind():
    try:
        return jax.devices()[0].device_kind.lower()
    except Exception:
        return ""


def _default_slab_dtype():
    # bf16 VALU exists on v6e / v7x; v5e has no bf16 VPU -> keep f32 slabs.
    kind = _device_kind()
    if ("v6" in kind) or ("v7" in kind):
        return jnp.bfloat16
    return jnp.float32


def _vmem_limit_bytes():
    # ~2/3 of physical VMEM so double-buffered blocks never OOM (v7x: 64 MiB),
    # capped at 96 MiB on the 128 MiB generations.
    try:
        cap = int(pltpu.get_tpu_info().vmem_capacity_bytes)
        return min((cap * 2) // 3, 96 * 1024 * 1024)
    except Exception:
        pass
    kind = _device_kind()
    if "v7" in kind:
        return 40 * 1024 * 1024
    if ("v5" in kind) or ("v6" in kind):
        return 96 * 1024 * 1024
    return None  # leave the compiler default


# ---------------------------------------------------------------------------
# Pass 1: depthwise 5x5 stride-2 + BN1 partial statistics (gridded).
# ---------------------------------------------------------------------------
def _dw_stats_kernel(x00_ref, x01_ref, x10_ref, x11_ref, dw_ref,
                     h_ref, stats_ref):
    """One overlapping row block.

    x{ph}{pw}_ref : (1, TOH+2, OW+2, C) row block of the (row,col)-parity
                    slab of the padded, already-ReLU'd input (bf16 or f32).
    dw_ref        : (25, 1, C) f32 depthwise weights, tap index = kh*5 + kw.
    h_ref         : (1, TOH, OW, C) f32 depthwise output block.
    stats_ref     : (1, 2, C)  f32 per-block [sum, sum-of-squares] over the
                    block's TOH*OW pixels (combined into BN1 stats in pass 2).
    """
    _, toh, ow, c = h_ref.shape
    refs = {(0, 0): x00_ref, (0, 1): x01_ref,
            (1, 0): x10_ref, (1, 1): x11_ref}

    # Hoisted column shifts, built directly from the refs: 5 unique column
    # offsets x 2 row parities instead of one slice per tap (25 -> 10).
    cols = {}
    for pw, b in ((0, 0), (0, 1), (0, 2), (1, 0), (1, 1)):
        for ph in (0, 1):
            cols[(ph, pw, b)] = refs[(ph, pw)][0, :, b:b + ow, :]

    # 25 unrolled multiply-accumulate taps, f32 accumulation regardless of
    # slab dtype.  Row shift = leading-dim offset; weight = leading-dim
    # ref index (pure address offset).
    acc = jnp.zeros((toh, ow, c), jnp.float32)
    for kh in range(5):
        ph, a = kh % 2, kh // 2
        for kw in range(5):
            pw, b = kw % 2, kw // 2
            tap = cols[(ph, pw, b)][a:a + toh]            # (TOH, OW, C)
            wk = dw_ref[kh * 5 + kw]                      # (1, C) f32
            acc = acc + tap.astype(jnp.float32) * wk

    h_ref[...] = acc[None]

    s = jnp.sum(acc, axis=(0, 1), keepdims=True)          # (1, 1, C)
    ss = jnp.sum(acc * acc, axis=(0, 1), keepdims=True)   # (1, 1, C)
    stats_ref[...] = jnp.concatenate([s, ss], axis=1)     # (1, 2, C)


# ---------------------------------------------------------------------------
# Pass 2: BN1+ReLU -> 1x1 conv -> BN2(scale) -> 1x1 conv -> BN3 (resident).
# ---------------------------------------------------------------------------
def _head_kernel(stats_ref, h_ref, g1_ref, b1_ref, w1_ref, g2_ref,
                 w2_ref, g3_ref, b3_ref, out_ref, *, eps):
    """stats_ref: (NB, 2, C1) pass-1 partial sums.  h_ref: (M, C1) f32.
    w1: (C1, C2) bf16; w2: (C2, C3P) bf16 zero-padded to 256 lanes.
    out_ref: (M, C3P) f32 lane-dense."""
    m = h_ref.shape[0]
    inv_m = 1.0 / m

    st = stats_ref[...]                                    # (NB, 2, C1)
    mean1 = jnp.sum(st[:, 0:1, :], axis=0) * inv_m         # (1, C1)
    ex2_1 = jnp.sum(st[:, 1:2, :], axis=0) * inv_m
    # One-pass variance can go slightly negative from cancellation: clamp.
    var1 = jnp.maximum(ex2_1 - mean1 * mean1, 0.0)
    scale1 = g1_ref[...] * lax.rsqrt(var1 + eps)
    shift1 = b1_ref[...] - mean1 * scale1
    y = jnp.maximum(h_ref[...] * scale1 + shift1, 0.0)

    # 1x1 conv 96 -> 56: bf16 MXU matmul, f32 accumulation.
    h1 = jnp.dot(y.astype(jnp.bfloat16), w1_ref[...],
                 preferred_element_type=jnp.float32)

    # BN2 folded to a pure per-channel scale: the constant row
    # (beta2 - mean2*scale2) it would add to h1 @ w2 is removed exactly by
    # BN3's batch-mean subtraction.  NOTE: valid only with training-mode
    # (batch-statistics) BN3.
    mean2 = jnp.sum(h1, axis=0, keepdims=True) * inv_m
    ex2_2 = jnp.sum(h1 * h1, axis=0, keepdims=True) * inv_m
    var2 = jnp.maximum(ex2_2 - mean2 * mean2, 0.0)
    scale2 = g2_ref[...] * lax.rsqrt(var2 + eps)
    h1s = (h1 * scale2).astype(jnp.bfloat16)

    # 1x1 conv 56 -> C3P (lane-dense, zero-padded 168 -> 256).
    h2 = jnp.dot(h1s, w2_ref[...], preferred_element_type=jnp.float32)

    # BN3; zero-padded channels stay exactly zero (w2/g3/b3 pads are 0).
    mean3 = jnp.sum(h2, axis=0, keepdims=True) * inv_m
    ex2_3 = jnp.sum(h2 * h2, axis=0, keepdims=True) * inv_m
    var3 = jnp.maximum(ex2_3 - mean3 * mean3, 0.0)
    scale3 = g3_ref[...] * lax.rsqrt(var3 + eps)
    shift3 = b3_ref[...] - mean3 * scale3
    out_ref[...] = h2 * scale3 + shift3


# ---------------------------------------------------------------------------
# Wrapper
# ---------------------------------------------------------------------------
def _pick_row_tile(oh):
    # Largest divisor of OH that is <= 16 (keeps the halo duplication at
    # 2/TOH and gives multiple pipelined blocks).
    for t in range(min(oh, 16), 0, -1):
        if oh % t == 0:
            return t
    return oh


def _row_blocks(slab, toh):
    """(N, OH+2, OWP2, C) parity slab -> (N*G, TOH+2, OWP2, C) overlapping
    row blocks; block b = n*G + g covers output rows [g*TOH, (g+1)*TOH)."""
    n, ohp2, owp2, c = slab.shape
    g = (ohp2 - 2) // toh
    blocks = [slab[:, i * toh:i * toh + toh + 2] for i in range(g)]
    return jnp.stack(blocks, axis=1).reshape(n * g, toh + 2, owp2, c)


def mnasnet_block(x_nchw, params, slab_dtype=None):
    dw, g1, b1, w1, g2, b2, w2, g3, b3 = params
    del b2  # folded away (see _head_kernel)
    c1 = dw.shape[-1]
    c2, c3 = w2.shape
    if slab_dtype is None:
        slab_dtype = _default_slab_dtype()

    # Leading ReLU commutes with the zero pad; XLA fuses relu + pad + parity
    # split + row blocking into the slab-producing fusion.
    x = jnp.maximum(jnp.transpose(x_nchw, (0, 2, 3, 1)).astype(jnp.float32), 0.0)
    n, h, w, _ = x.shape
    assert h % 2 == 0 and w % 2 == 0, "even spatial dims expected"
    oh, ow = h // 2, w // 2
    m = n * oh * ow
    toh = _pick_row_tile(oh)
    nb = n * (oh // toh)
    owp2 = ow + 2

    xp = jnp.pad(x, ((0, 0), (2, 2), (2, 2), (0, 0))).astype(slab_dtype)
    # parity order (0,0),(0,1),(1,0),(1,1) == kernel args x00,x01,x10,x11
    slabs = [_row_blocks(xp[:, ph::2, pw::2, :], toh)
             for ph in (0, 1) for pw in (0, 1)]

    dw25 = dw.reshape(25, 1, c1).astype(jnp.float32)
    vmem_limit = _vmem_limit_bytes()

    # ---- Pass 1: depthwise + per-block BN1 partial stats -----------------
    slab_bytes = nb * (toh + 2) * owp2 * c1 * jnp.dtype(slab_dtype).itemsize
    cost1 = pl.CostEstimate(
        flops=2 * 25 * m * c1 + 4 * m * c1,
        transcendentals=0,
        bytes_accessed=4 * slab_bytes + m * c1 * 4 + nb * 2 * c1 * 4)

    slab_spec = pl.BlockSpec((1, toh + 2, owp2, c1),
                             lambda bidx: (bidx, 0, 0, 0))
    # TODO(synk): for OW not a multiple of 8 the (OW, C) tiles are masked
    # (correct, mildly suboptimal); padding OW would need pad-row masking in
    # the BN statistics.
    h_dw, stats1 = pl.pallas_call(
        _dw_stats_kernel,
        grid=(nb,),
        in_specs=[slab_spec, slab_spec, slab_spec, slab_spec,
                  pl.BlockSpec((25, 1, c1), lambda bidx: (0, 0, 0))],
        out_specs=(pl.BlockSpec((1, toh, ow, c1), lambda bidx: (bidx, 0, 0, 0)),
                   pl.BlockSpec((1, 2, c1), lambda bidx: (bidx, 0, 0))),
        out_shape=(jax.ShapeDtypeStruct((nb, toh, ow, c1), jnp.float32),
                   jax.ShapeDtypeStruct((nb, 2, c1), jnp.float32)),
        compiler_params=pltpu.CompilerParams(
            dimension_semantics=("parallel",),
            vmem_limit_bytes=vmem_limit),
        cost_estimate=cost1,
    )(slabs[0], slabs[1], slabs[2], slabs[3], dw25)

    # (nb, toh, ow, c1) and (m, c1) share the same HBM layout: free reshape.
    h2d = h_dw.reshape(m, c1)

    # Lane-dense matmul-2 output: pad C3 168 -> 256 (zero-padded w2/g3/b3).
    c3p = ((c3 + 127) // 128) * 128
    w1b = w1.astype(jnp.bfloat16)
    w2p = jnp.pad(w2, ((0, 0), (0, c3p - c3))).astype(jnp.bfloat16)
    g3p = jnp.pad(g3, (0, c3p - c3))
    b3p = jnp.pad(b3, (0, c3p - c3))

    vmem = pl.BlockSpec(memory_space=pltpu.MemorySpace.VMEM)
    cost2 = pl.CostEstimate(
        flops=2 * m * (c1 * c2 + c2 * c3p) + 12 * m * (c1 + c2 + c3p),
        transcendentals=0,
        bytes_accessed=m * (c1 + c3p) * 4)

    # ---- Pass 2: BN1+ReLU, two bf16 MXU matmuls, BN2(scale), BN3 ---------
    # TODO(synk): pass 2 keeps the (M, 96/56/256) tensors fully resident;
    # for very large N*OH*OW it needs the same grid + partial-stats staging
    # as pass 1 (one stats pass per matmul) to stay within VMEM.
    out2d = pl.pallas_call(
        functools.partial(_head_kernel, eps=EPS),
        out_shape=jax.ShapeDtypeStruct((m, c3p), jnp.float32),
        in_specs=[vmem] * 9,
        out_specs=vmem,
        compiler_params=pltpu.CompilerParams(vmem_limit_bytes=vmem_limit),
        cost_estimate=cost2,
    )(stats1, h2d,
      g1.reshape(1, -1), b1.reshape(1, -1), w1b,
      g2.reshape(1, -1), w2p, g3p.reshape(1, -1), b3p.reshape(1, -1))

    out = out2d[:, :c3].reshape(n, oh, ow, c3)
    return jnp.transpose(out, (0, 3, 1, 2))                 # NHWC -> NCHW


# ---------------------------------------------------------------------------
# References for verification
# ---------------------------------------------------------------------------
def _one_pass_norm(z2d, g, b, eps):
    inv_m = 1.0 / z2d.shape[0]
    mean = jnp.sum(z2d, axis=0, keepdims=True) * inv_m
    var = jnp.maximum(jnp.sum(z2d * z2d, axis=0, keepdims=True) * inv_m
                      - mean * mean, 0.0)
    scale = g * lax.rsqrt(var + eps)
    shift = None if b is None else b - mean * scale
    return scale, shift


def reference_matched(x_nchw, params, slab_dtype, eps=EPS):
    """Pure-JAX mirror of the kernel's numerics: same tap order, same slab
    dtype, same one-pass clamped statistics, same bf16 matmul operands and
    the same BN2 fold.  Verifies the Pallas plumbing tightly."""
    dw, g1, b1, w1, g2, b2, w2, g3, b3 = params
    del b2
    x = jnp.maximum(jnp.transpose(x_nchw, (0, 2, 3, 1)).astype(jnp.float32), 0.0)
    n, h, w, c1 = x.shape
    oh, ow = h // 2, w // 2
    m = n * oh * ow
    xp = jnp.pad(x, ((0, 0), (2, 2), (2, 2), (0, 0))).astype(slab_dtype)
    par = {(ph, pw): xp[:, ph::2, pw::2, :] for ph in (0, 1) for pw in (0, 1)}

    acc = jnp.zeros((n, oh, ow, c1), jnp.float32)
    for kh in range(5):
        ph, a = kh % 2, kh // 2
        for kw in range(5):
            pw, b = kw % 2, kw // 2
            tap = par[(ph, pw)][:, a:a + oh, b:b + ow, :].astype(jnp.float32)
            acc = acc + tap * dw[kh, kw].reshape(1, 1, 1, c1)
    hm = acc.reshape(m, c1)

    scale1, shift1 = _one_pass_norm(hm, g1.reshape(1, -1), b1.reshape(1, -1), eps)
    y = jnp.maximum(hm * scale1 + shift1, 0.0)
    h1 = jnp.dot(y.astype(jnp.bfloat16), w1.astype(jnp.bfloat16),
                 preferred_element_type=jnp.float32)
    scale2, _ = _one_pass_norm(h1, g2.reshape(1, -1), None, eps)
    h2 = jnp.dot((h1 * scale2).astype(jnp.bfloat16), w2.astype(jnp.bfloat16),
                 preferred_element_type=jnp.float32)
    scale3, shift3 = _one_pass_norm(h2, g3.reshape(1, -1), b3.reshape(1, -1), eps)
    out = (h2 * scale3 + shift3).reshape(n, oh, ow, -1)
    return jnp.transpose(out, (0, 3, 1, 2))


def reference_exact(x_nchw, params, eps=EPS):
    """Faithful fp32 reference in the original PyTorch op order."""
    dw, g1, b1, w1, g2, b2, w2, g3, b3 = params
    x = jnp.transpose(x_nchw, (0, 2, 3, 1)).astype(jnp.float32)
    x = jnp.maximum(x, 0.0)
    y = lax.conv_general_dilated(
        x, dw.reshape(5, 5, 1, dw.shape[-1]),
        window_strides=(2, 2), padding=((2, 2), (2, 2)),
        dimension_numbers=("NHWC", "HWIO", "NHWC"),
        feature_group_count=dw.shape[-1],
        precision=lax.Precision.HIGHEST)

    def bn(z, g, b):
        axs = (0, 1, 2)
        mu = jnp.mean(z, axis=axs, keepdims=True)
        v = jnp.mean((z - mu) ** 2, axis=axs, keepdims=True)
        return (z - mu) / jnp.sqrt(v + eps) * g + b

    y = bn(y, g1, b1)
    y = jnp.maximum(y, 0.0)
    y = jnp.einsum("nhwc,cd->nhwd", y, w1, precision=lax.Precision.HIGHEST)
    y = bn(y, g2, b2)
    y = jnp.einsum("nhwc,cd->nhwd", y, w2, precision=lax.Precision.HIGHEST)
    y = bn(y, g3, b3)
    return jnp.transpose(y, (0, 3, 1, 2))


if __name__ == "__main__":
    key = jax.random.PRNGKey(0)
    ks = jax.random.split(key, 10)

    # Channel counts fixed by the module (96 -> 96 -> 56 -> 168); batch and
    # spatial dims kept small.
    N, C1, H, W = 2, 96, 16, 16
    C2, C3 = 56, 168

    x = jax.random.normal(ks[0], (N, C1, H, W), jnp.float32)
    dw = 0.2 * jax.random.normal(ks[1], (5, 5, C1), jnp.float32)
    g1 = 1.0 + 0.1 * jax.random.normal(ks[2], (C1,), jnp.float32)
    b1 = 0.1 * jax.random.normal(ks[3], (C1,), jnp.float32)
    w1 = jax.random.normal(ks[4], (C1, C2), jnp.float32) / jnp.sqrt(C1)
    g2 = 1.0 + 0.1 * jax.random.normal(ks[5], (C2,), jnp.float32)
    b2 = 0.1 * jax.random.normal(ks[6], (C2,), jnp.float32)
    w2 = jax.random.normal(ks[7], (C2, C3), jnp.float32) / jnp.sqrt(C2)
    g3 = 1.0 + 0.1 * jax.random.normal(ks[8], (C3,), jnp.float32)
    b3 = 0.1 * jax.random.normal(ks[9], (C3,), jnp.float32)
    params = (dw, g1, b1, w1, g2, b2, w2, g3, b3)

    slab_dtype = _default_slab_dtype()
    out = jax.block_until_ready(mnasnet_block(x, params, slab_dtype=slab_dtype))
    assert out.shape == (N, C3, H // 2, W // 2), out.shape

    # Tight check: reference mirrors the kernel's dtype pipeline and stats.
    ref_m = reference_matched(x, params, slab_dtype)
    np.testing.assert_allclose(np.asarray(out), np.asarray(ref_m),
                               rtol=1e-2, atol=1e-2)

    # Fidelity check vs exact fp32 math: deviation is the bf16 operand
    # rounding of the two matmuls (plus bf16 slab storage on v6e/v7x).
    if slab_dtype == jnp.bfloat16:
        rtol_e, atol_e = 5e-2, 1e-1
    else:
        rtol_e, atol_e = 2e-2, 5e-2
    ref_e = reference_exact(x, params)
    np.testing.assert_allclose(np.asarray(out), np.asarray(ref_e),
                               rtol=rtol_e, atol=atol_e)

    print("KERNEL_OK")
</pallas_src>

<mosaic_0001>
module attributes {stable_mosaic.version = 11 : i64} {
  func.func @_dw_stats_kernel(%arg0: i32, %arg1: memref<1x10x10x96xf32, #tpu.memory_space<vmem>>, %arg2: memref<1x10x10x96xf32, #tpu.memory_space<vmem>>, %arg3: memref<1x10x10x96xf32, #tpu.memory_space<vmem>>, %arg4: memref<1x10x10x96xf32, #tpu.memory_space<vmem>>, %arg5: memref<25x1x96xf32, #tpu.memory_space<vmem>>, %arg6: memref<1x8x8x96xf32, #tpu.memory_space<vmem>>, %arg7: memref<1x2x96xf32, #tpu.memory_space<vmem>>) attributes {dimension_semantics = [#tpu.dimension_semantics<parallel>], iteration_bounds = array<i64: 2>, scalar_prefetch = 0 : i64, scratch_operands = 0 : i64, tpu.core_type = #tpu.core_type<tc>, window_params = [{transform_indices = @transform_0, window_bounds = array<i64: 1, 10, 10, 96>}, {transform_indices = @transform_1, window_bounds = array<i64: 1, 10, 10, 96>}, {transform_indices = @transform_2, window_bounds = array<i64: 1, 10, 10, 96>}, {transform_indices = @transform_3, window_bounds = array<i64: 1, 10, 10, 96>}, {pipeline_mode = #tpu.pipeline_mode<synchronous>, transform_indices = @transform_4, window_bounds = array<i64: 25, 1, 96>}, {transform_indices = @transform_5, window_bounds = array<i64: 1, 8, 8, 96>}, {transform_indices = @transform_6, window_bounds = array<i64: 1, 2, 96>}]} {
    %c0 = arith.constant 0 : index
    %c0_0 = arith.constant 0 : index
    %c0_1 = arith.constant 0 : index
    %c0_2 = arith.constant 0 : index
    %0 = vector.load %arg1[%c0, %c0_0, %c0_1, %c0_2] : memref<1x10x10x96xf32, #tpu.memory_space<vmem>>, vector<1x10x8x96xf32>
    %1 = vector.shape_cast %0 : vector<1x10x8x96xf32> to vector<10x8x96xf32>
    %c0_3 = arith.constant 0 : index
    %c0_4 = arith.constant 0 : index
    %c0_5 = arith.constant 0 : index
    %c0_6 = arith.constant 0 : index
    %2 = vector.load %arg3[%c0_3, %c0_4, %c0_5, %c0_6] : memref<1x10x10x96xf32, #tpu.memory_space<vmem>>, vector<1x10x8x96xf32>
    %3 = vector.shape_cast %2 : vector<1x10x8x96xf32> to vector<10x8x96xf32>
    %c0_7 = arith.constant 0 : index
    %c0_8 = arith.constant 0 : index
    %c1 = arith.constant 1 : index
    %c0_9 = arith.constant 0 : index
    %4 = vector.load %arg1[%c0_7, %c0_8, %c1, %c0_9] : memref<1x10x10x96xf32, #tpu.memory_space<vmem>>, vector<1x10x8x96xf32>
    %5 = vector.shape_cast %4 : vector<1x10x8x96xf32> to vector<10x8x96xf32>
    %c0_10 = arith.constant 0 : index
    %c0_11 = arith.constant 0 : index
    %c1_12 = arith.constant 1 : index
    %c0_13 = arith.constant 0 : index
    %6 = vector.load %arg3[%c0_10, %c0_11, %c1_12, %c0_13] : memref<1x10x10x96xf32, #tpu.memory_space<vmem>>, vector<1x10x8x96xf32>
    %7 = vector.shape_cast %6 : vector<1x10x8x96xf32> to vector<10x8x96xf32>
    %c0_14 = arith.constant 0 : index
    %c0_15 = arith.constant 0 : index
    %c2 = arith.constant 2 : index
    %c0_16 = arith.constant 0 : index
    %8 = vector.load %arg1[%c0_14, %c0_15, %c2, %c0_16] : memref<1x10x10x96xf32, #tpu.memory_space<vmem>>, vector<1x10x8x96xf32>
    %9 = vector.shape_cast %8 : vector<1x10x8x96xf32> to vector<10x8x96xf32>
    %c0_17 = arith.constant 0 : index
    %c0_18 = arith.constant 0 : index
    %c2_19 = arith.constant 2 : index
    %c0_20 = arith.constant 0 : index
    %10 = vector.load %arg3[%c0_17, %c0_18, %c2_19, %c0_20] : memref<1x10x10x96xf32, #tpu.memory_space<vmem>>, vector<1x10x8x96xf32>
    %11 = vector.shape_cast %10 : vector<1x10x8x96xf32> to vector<10x8x96xf32>
    %c0_21 = arith.constant 0 : index
    %c0_22 = arith.constant 0 : index
    %c0_23 = arith.constant 0 : index
    %c0_24 = arith.constant 0 : index
    %12 = vector.load %arg2[%c0_21, %c0_22, %c0_23, %c0_24] : memref<1x10x10x96xf32, #tpu.memory_space<vmem>>, vector<1x10x8x96xf32>
    %13 = vector.shape_cast %12 : vector<1x10x8x96xf32> to vector<10x8x96xf32>
    %c0_25 = arith.constant 0 : index
    %c0_26 = arith.constant 0 : index
    %c0_27 = arith.constant 0 : index
    %c0_28 = arith.constant 0 : index
    %14 = vector.load %arg4[%c0_25, %c0_26, %c0_27, %c0_28] : memref<1x10x10x96xf32, #tpu.memory_space<vmem>>, vector<1x10x8x96xf32>
    %15 = vector.shape_cast %14 : vector<1x10x8x96xf32> to vector<10x8x96xf32>
    %c0_29 = arith.constant 0 : index
    %c0_30 = arith.constant 0 : index
    %c1_31 = arith.constant 1 : index
    %c0_32 = arith.constant 0 : index
    %16 = vector.load %arg2[%c0_29, %c0_30, %c1_31, %c0_32] : memref<1x10x10x96xf32, #tpu.memory_space<vmem>>, vector<1x10x8x96xf32>
    %17 = vector.shape_cast %16 : vector<1x10x8x96xf32> to vector<10x8x96xf32>
    %c0_33 = arith.constant 0 : index
    %c0_34 = arith.constant 0 : index
    %c1_35 = arith.constant 1 : index
    %c0_36 = arith.constant 0 : index
    %18 = vector.load %arg4[%c0_33, %c0_34, %c1_35, %c0_36] : memref<1x10x10x96xf32, #tpu.memory_space<vmem>>, vector<1x10x8x96xf32>
    %19 = vector.shape_cast %18 : vector<1x10x8x96xf32> to vector<10x8x96xf32>
    %cst = arith.constant 0.000000e+00 : f32
    %20 = vector.broadcast %cst : f32 to vector<8x8x96xf32>
    %21 = vector.extract_strided_slice %1 {offsets = [0, 0, 0], sizes = [8, 8, 96], strides = [1, 1, 1]} : vector<10x8x96xf32> to vector<8x8x96xf32>
    %c0_37 = arith.constant 0 : index
    %c0_38 = arith.constant 0 : index
    %c0_39 = arith.constant 0 : index
    %22 = vector.load %arg5[%c0_37, %c0_38, %c0_39] : memref<25x1x96xf32, #tpu.memory_space<vmem>>, vector<1x1x96xf32>
    %23 = vector.shape_cast %22 : vector<1x1x96xf32> to vector<1x96xf32>
    %24 = vector.shape_cast %23 : vector<1x96xf32> to vector<1x1x96xf32>
    %25 = vector.broadcast %24 : vector<1x1x96xf32> to vector<8x8x96xf32>
    %26 = arith.mulf %21, %25 : vector<8x8x96xf32>
    %27 = arith.addf %20, %26 : vector<8x8x96xf32>
    %28 = vector.extract_strided_slice %13 {offsets = [0, 0, 0], sizes = [8, 8, 96], strides = [1, 1, 1]} : vector<10x8x96xf32> to vector<8x8x96xf32>
    %c1_40 = arith.constant 1 : index
    %c0_41 = arith.constant 0 : index
    %c0_42 = arith.constant 0 : index
    %29 = vector.load %arg5[%c1_40, %c0_41, %c0_42] : memref<25x1x96xf32, #tpu.memory_space<vmem>>, vector<1x1x96xf32>
    %30 = vector.shape_cast %29 : vector<1x1x96xf32> to vector<1x96xf32>
    %31 = vector.shape_cast %30 : vector<1x96xf32> to vector<1x1x96xf32>
    %32 = vector.broadcast %31 : vector<1x1x96xf32> to vector<8x8x96xf32>
    %33 = arith.mulf %28, %32 : vector<8x8x96xf32>
    %34 = arith.addf %27, %33 : vector<8x8x96xf32>
    %35 = vector.extract_strided_slice %5 {offsets = [0, 0, 0], sizes = [8, 8, 96], strides = [1, 1, 1]} : vector<10x8x96xf32> to vector<8x8x96xf32>
    %c2_43 = arith.constant 2 : index
    %c0_44 = arith.constant 0 : index
    %c0_45 = arith.constant 0 : index
    %36 = vector.load %arg5[%c2_43, %c0_44, %c0_45] : memref<25x1x96xf32, #tpu.memory_space<vmem>>, vector<1x1x96xf32>
    %37 = vector.shape_cast %36 : vector<1x1x96xf32> to vector<1x96xf32>
    %38 = vector.shape_cast %37 : vector<1x96xf32> to vector<1x1x96xf32>
    %39 = vector.broadcast %38 : vector<1x1x96xf32> to vector<8x8x96xf32>
    %40 = arith.mulf %35, %39 : vector<8x8x96xf32>
    %41 = arith.addf %34, %40 : vector<8x8x96xf32>
    %42 = vector.extract_strided_slice %17 {offsets = [0, 0, 0], sizes = [8, 8, 96], strides = [1, 1, 1]} : vector<10x8x96xf32> to vector<8x8x96xf32>
    %c3 = arith.constant 3 : index
    %c0_46 = arith.constant 0 : index
    %c0_47 = arith.constant 0 : index
    %43 = vector.load %arg5[%c3, %c0_46, %c0_47] : memref<25x1x96xf32, #tpu.memory_space<vmem>>, vector<1x1x96xf32>
    %44 = vector.shape_cast %43 : vector<1x1x96xf32> to vector<1x96xf32>
    %45 = vector.shape_cast %44 : vector<1x96xf32> to vector<1x1x96xf32>
    %46 = vector.broadcast %45 : vector<1x1x96xf32> to vector<8x8x96xf32>
    %47 = arith.mulf %42, %46 : vector<8x8x96xf32>
    %48 = arith.addf %41, %47 : vector<8x8x96xf32>
    %49 = vector.extract_strided_slice %9 {offsets = [0, 0, 0], sizes = [8, 8, 96], strides = [1, 1, 1]} : vector<10x8x96xf32> to vector<8x8x96xf32>
    %c4 = arith.constant 4 : index
    %c0_48 = arith.constant 0 : index
    %c0_49 = arith.constant 0 : index
    %50 = vector.load %arg5[%c4, %c0_48, %c0_49] : memref<25x1x96xf32, #tpu.memory_space<vmem>>, vector<1x1x96xf32>
    %51 = vector.shape_cast %50 : vector<1x1x96xf32> to vector<1x96xf32>
    %52 = vector.shape_cast %51 : vector<1x96xf32> to vector<1x1x96xf32>
    %53 = vector.broadcast %52 : vector<1x1x96xf32> to vector<8x8x96xf32>
    %54 = arith.mulf %49, %53 : vector<8x8x96xf32>
    %55 = arith.addf %48, %54 : vector<8x8x96xf32>
    %56 = vector.extract_strided_slice %3 {offsets = [0, 0, 0], sizes = [8, 8, 96], strides = [1, 1, 1]} : vector<10x8x96xf32> to vector<8x8x96xf32>
    %c5 = arith.constant 5 : index
    %c0_50 = arith.constant 0 : index
    %c0_51 = arith.constant 0 : index
    %57 = vector.load %arg5[%c5, %c0_50, %c0_51] : memref<25x1x96xf32, #tpu.memory_space<vmem>>, vector<1x1x96xf32>
    %58 = vector.shape_cast %57 : vector<1x1x96xf32> to vector<1x96xf32>
    %59 = vector.shape_cast %58 : vector<1x96xf32> to vector<1x1x96xf32>
    %60 = vector.broadcast %59 : vector<1x1x96xf32> to vector<8x8x96xf32>
    %61 = arith.mulf %56, %60 : vector<8x8x96xf32>
    %62 = arith.addf %55, %61 : vector<8x8x96xf32>
    %63 = vector.extract_strided_slice %15 {offsets = [0, 0, 0], sizes = [8, 8, 96], strides = [1, 1, 1]} : vector<10x8x96xf32> to vector<8x8x96xf32>
    %c6 = arith.constant 6 : index
    %c0_52 = arith.constant 0 : index
    %c0_53 = arith.constant 0 : index
    %64 = vector.load %arg5[%c6, %c0_52, %c0_53] : memref<25x1x96xf32, #tpu.memory_space<vmem>>, vector<1x1x96xf32>
    %65 = vector.shape_cast %64 : vector<1x1x96xf32> to vector<1x96xf32>
    %66 = vector.shape_cast %65 : vector<1x96xf32> to vector<1x1x96xf32>
    %67 = vector.broadcast %66 : vector<1x1x96xf32> to vector<8x8x96xf32>
    %68 = arith.mulf %63, %67 : vector<8x8x96xf32>
    %69 = arith.addf %62, %68 : vector<8x8x96xf32>
    %70 = vector.extract_strided_slice %7 {offsets = [0, 0, 0], sizes = [8, 8, 96], strides = [1, 1, 1]} : vector<10x8x96xf32> to vector<8x8x96xf32>
    %c7 = arith.constant 7 : index
    %c0_54 = arith.constant 0 : index
    %c0_55 = arith.constant 0 : index
    %71 = vector.load %arg5[%c7, %c0_54, %c0_55] : memref<25x1x96xf32, #tpu.memory_space<vmem>>, vector<1x1x96xf32>
    %72 = vector.shape_cast %71 : vector<1x1x96xf32> to vector<1x96xf32>
    %73 = vector.shape_cast %72 : vector<1x96xf32> to vector<1x1x96xf32>
    %74 = vector.broadcast %73 : vector<1x1x96xf32> to vector<8x8x96xf32>
    %75 = arith.mulf %70, %74 : vector<8x8x96xf32>
    %76 = arith.addf %69, %75 : vector<8x8x96xf32>
    %77 = vector.extract_strided_slice %19 {offsets = [0, 0, 0], sizes = [8, 8, 96], strides = [1, 1, 1]} : vector<10x8x96xf32> to vector<8x8x96xf32>
    %c8 = arith.constant 8 : index
    %c0_56 = arith.constant 0 : index
    %c0_57 = arith.constant 0 : index
    %78 = vector.load %arg5[%c8, %c0_56, %c0_57] : memref<25x1x96xf32, #tpu.memory_space<vmem>>, vector<1x1x96xf32>
    %79 = vector.shape_cast %78 : vector<1x1x96xf32> to vector<1x96xf32>
    %80 = vector.shape_cast %79 : vector<1x96xf32> to vector<1x1x96xf32>
    %81 = vector.broadcast %80 : vector<1x1x96xf32> to vector<8x8x96xf32>
    %82 = arith.mulf %77, %81 : vector<8x8x96xf32>
    %83 = arith.addf %76, %82 : vector<8x8x96xf32>
    %84 = vector.extract_strided_slice %11 {offsets = [0, 0, 0], sizes = [8, 8, 96], strides = [1, 1, 1]} : vector<10x8x96xf32> to vector<8x8x96xf32>
    %c9 = arith.constant 9 : index
    %c0_58 = arith.constant 0 : index
    %c0_59 = arith.constant 0 : index
    %85 = vector.load %arg5[%c9, %c0_58, %c0_59] : memref<25x1x96xf32, #tpu.memory_space<vmem>>, vector<1x1x96xf32>
    %86 = vector.shape_cast %85 : vector<1x1x96xf32> to vector<1x96xf32>
    %87 = vector.shape_cast %86 : vector<1x96xf32> to vector<1x1x96xf32>
    %88 = vector.broadcast %87 : vector<1x1x96xf32> to vector<8x8x96xf32>
    %89 = arith.mulf %84, %88 : vector<8x8x96xf32>
    %90 = arith.addf %83, %89 : vector<8x8x96xf32>
    %91 = vector.extract_strided_slice %1 {offsets = [1, 0, 0], sizes = [8, 8, 96], strides = [1, 1, 1]} : vector<10x8x96xf32> to vector<8x8x96xf32>
    %c10 = arith.constant 10 : index
    %c0_60 = arith.constant 0 : index
    %c0_61 = arith.constant 0 : index
    %92 = vector.load %arg5[%c10, %c0_60, %c0_61] : memref<25x1x96xf32, #tpu.memory_space<vmem>>, vector<1x1x96xf32>
    %93 = vector.shape_cast %92 : vector<1x1x96xf32> to vector<1x96xf32>
    %94 = vector.shape_cast %93 : vector<1x96xf32> to vector<1x1x96xf32>
    %95 = vector.broadcast %94 : vector<1x1x96xf32> to vector<8x8x96xf32>
    %96 = arith.mulf %91, %95 : vector<8x8x96xf32>
    %97 = arith.addf %90, %96 : vector<8x8x96xf32>
    %98 = vector.extract_strided_slice %13 {offsets = [1, 0, 0], sizes = [8, 8, 96], strides = [1, 1, 1]} : vector<10x8x96xf32> to vector<8x8x96xf32>
    %c11 = arith.constant 11 : index
    %c0_62 = arith.constant 0 : index
    %c0_63 = arith.constant 0 : index
    %99 = vector.load %arg5[%c11, %c0_62, %c0_63] : memref<25x1x96xf32, #tpu.memory_space<vmem>>, vector<1x1x96xf32>
    %100 = vector.shape_cast %99 : vector<1x1x96xf32> to vector<1x96xf32>
    %101 = vector.shape_cast %100 : vector<1x96xf32> to vector<1x1x96xf32>
    %102 = vector.broadcast %101 : vector<1x1x96xf32> to vector<8x8x96xf32>
    %103 = arith.mulf %98, %102 : vector<8x8x96xf32>
    %104 = arith.addf %97, %103 : vector<8x8x96xf32>
    %105 = vector.extract_strided_slice %5 {offsets = [1, 0, 0], sizes = [8, 8, 96], strides = [1, 1, 1]} : vector<10x8x96xf32> to vector<8x8x96xf32>
    %c12 = arith.constant 12 : index
    %c0_64 = arith.constant 0 : index
    %c0_65 = arith.constant 0 : index
    %106 = vector.load %arg5[%c12, %c0_64, %c0_65] : memref<25x1x96xf32, #tpu.memory_space<vmem>>, vector<1x1x96xf32>
    %107 = vector.shape_cast %106 : vector<1x1x96xf32> to vector<1x96xf32>
    %108 = vector.shape_cast %107 : vector<1x96xf32> to vector<1x1x96xf32>
    %109 = vector.broadcast %108 : vector<1x1x96xf32> to vector<8x8x96xf32>
    %110 = arith.mulf %105, %109 : vector<8x8x96xf32>
    %111 = arith.addf %104, %110 : vector<8x8x96xf32>
    %112 = vector.extract_strided_slice %17 {offsets = [1, 0, 0], sizes = [8, 8, 96], strides = [1, 1, 1]} : vector<10x8x96xf32> to vector<8x8x96xf32>
    %c13 = arith.constant 13 : index
    %c0_66 = arith.constant 0 : index
    %c0_67 = arith.constant 0 : index
    %113 = vector.load %arg5[%c13, %c0_66, %c0_67] : memref<25x1x96xf32, #tpu.memory_space<vmem>>, vector<1x1x96xf32>
    %114 = vector.shape_cast %113 : vector<1x1x96xf32> to vector<1x96xf32>
    %115 = vector.shape_cast %114 : vector<1x96xf32> to vector<1x1x96xf32>
    %116 = vector.broadcast %115 : vector<1x1x96xf32> to vector<8x8x96xf32>
    %117 = arith.mulf %112, %116 : vector<8x8x96xf32>
    %118 = arith.addf %111, %117 : vector<8x8x96xf32>
    %119 = vector.extract_strided_slice %9 {offsets = [1, 0, 0], sizes = [8, 8, 96], strides = [1, 1, 1]} : vector<10x8x96xf32> to vector<8x8x96xf32>
    %c14 = arith.constant 14 : index
    %c0_68 = arith.constant 0 : index
    %c0_69 = arith.constant 0 : index
    %120 = vector.load %arg5[%c14, %c0_68, %c0_69] : memref<25x1x96xf32, #tpu.memory_space<vmem>>, vector<1x1x96xf32>
    %121 = vector.shape_cast %120 : vector<1x1x96xf32> to vector<1x96xf32>
    %122 = vector.shape_cast %121 : vector<1x96xf32> to vector<1x1x96xf32>
    %123 = vector.broadcast %122 : vector<1x1x96xf32> to vector<8x8x96xf32>
    %124 = arith.mulf %119, %123 : vector<8x8x96xf32>
    %125 = arith.addf %118, %124 : vector<8x8x96xf32>
    %126 = vector.extract_strided_slice %3 {offsets = [1, 0, 0], sizes = [8, 8, 96], strides = [1, 1, 1]} : vector<10x8x96xf32> to vector<8x8x96xf32>
    %c15 = arith.constant 15 : index
    %c0_70 = arith.constant 0 : index
    %c0_71 = arith.constant 0 : index
    %127 = vector.load %arg5[%c15, %c0_70, %c0_71] : memref<25x1x96xf32, #tpu.memory_space<vmem>>, vector<1x1x96xf32>
    %128 = vector.shape_cast %127 : vector<1x1x96xf32> to vector<1x96xf32>
    %129 = vector.shape_cast %128 : vector<1x96xf32> to vector<1x1x96xf32>
    %130 = vector.broadcast %129 : vector<1x1x96xf32> to vector<8x8x96xf32>
    %131 = arith.mulf %126, %130 : vector<8x8x96xf32>
    %132 = arith.addf %125, %131 : vector<8x8x96xf32>
    %133 = vector.extract_strided_slice %15 {offsets = [1, 0, 0], sizes = [8, 8, 96], strides = [1, 1, 1]} : vector<10x8x96xf32> to vector<8x8x96xf32>
    %c16 = arith.constant 16 : index
    %c0_72 = arith.constant 0 : index
    %c0_73 = arith.constant 0 : index
    %134 = vector.load %arg5[%c16, %c0_72, %c0_73] : memref<25x1x96xf32, #tpu.memory_space<vmem>>, vector<1x1x96xf32>
    %135 = vector.shape_cast %134 : vector<1x1x96xf32> to vector<1x96xf32>
    %136 = vector.shape_cast %135 : vector<1x96xf32> to vector<1x1x96xf32>
    %137 = vector.broadcast %136 : vector<1x1x96xf32> to vector<8x8x96xf32>
    %138 = arith.mulf %133, %137 : vector<8x8x96xf32>
    %139 = arith.addf %132, %138 : vector<8x8x96xf32>
    %140 = vector.extract_strided_slice %7 {offsets = [1, 0, 0], sizes = [8, 8, 96], strides = [1, 1, 1]} : vector<10x8x96xf32> to vector<8x8x96xf32>
    %c17 = arith.constant 17 : index
    %c0_74 = arith.constant 0 : index
    %c0_75 = arith.constant 0 : index
    %141 = vector.load %arg5[%c17, %c0_74, %c0_75] : memref<25x1x96xf32, #tpu.memory_space<vmem>>, vector<1x1x96xf32>
    %142 = vector.shape_cast %141 : vector<1x1x96xf32> to vector<1x96xf32>
    %143 = vector.shape_cast %142 : vector<1x96xf32> to vector<1x1x96xf32>
    %144 = vector.broadcast %143 : vector<1x1x96xf32> to vector<8x8x96xf32>
    %145 = arith.mulf %140, %144 : vector<8x8x96xf32>
    %146 = arith.addf %139, %145 : vector<8x8x96xf32>
    %147 = vector.extract_strided_slice %19 {offsets = [1, 0, 0], sizes = [8, 8, 96], strides = [1, 1, 1]} : vector<10x8x96xf32> to vector<8x8x96xf32>
    %c18 = arith.constant 18 : index
    %c0_76 = arith.constant 0 : index
    %c0_77 = arith.constant 0 : index
    %148 = vector.load %arg5[%c18, %c0_76, %c0_77] : memref<25x1x96xf32, #tpu.memory_space<vmem>>, vector<1x1x96xf32>
    %149 = vector.shape_cast %148 : vector<1x1x96xf32> to vector<1x96xf32>
    %150 = vector.shape_cast %149 : vector<1x96xf32> to vector<1x1x96xf32>
    %151 = vector.broadcast %150 : vector<1x1x96xf32> to vector<8x8x96xf32>
    %152 = arith.mulf %147, %151 : vector<8x8x96xf32>
    %153 = arith.addf %146, %152 : vector<8x8x96xf32>
    %154 = vector.extract_strided_slice %11 {offsets = [1, 0, 0], sizes = [8, 8, 96], strides = [1, 1, 1]} : vector<10x8x96xf32> to vector<8x8x96xf32>
    %c19 = arith.constant 19 : index
    %c0_78 = arith.constant 0 : index
    %c0_79 = arith.constant 0 : index
    %155 = vector.load %arg5[%c19, %c0_78, %c0_79] : memref<25x1x96xf32, #tpu.memory_space<vmem>>, vector<1x1x96xf32>
    %156 = vector.shape_cast %155 : vector<1x1x96xf32> to vector<1x96xf32>
    %157 = vector.shape_cast %156 : vector<1x96xf32> to vector<1x1x96xf32>
    %158 = vector.broadcast %157 : vector<1x1x96xf32> to vector<8x8x96xf32>
    %159 = arith.mulf %154, %158 : vector<8x8x96xf32>
    %160 = arith.addf %153, %159 : vector<8x8x96xf32>
    %161 = vector.extract_strided_slice %1 {offsets = [2, 0, 0], sizes = [8, 8, 96], strides = [1, 1, 1]} : vector<10x8x96xf32> to vector<8x8x96xf32>
    %c20 = arith.constant 20 : index
    %c0_80 = arith.constant 0 : index
    %c0_81 = arith.constant 0 : index
    %162 = vector.load %arg5[%c20, %c0_80, %c0_81] : memref<25x1x96xf32, #tpu.memory_space<vmem>>, vector<1x1x96xf32>
    %163 = vector.shape_cast %162 : vector<1x1x96xf32> to vector<1x96xf32>
    %164 = vector.shape_cast %163 : vector<1x96xf32> to vector<1x1x96xf32>
    %165 = vector.broadcast %164 : vector<1x1x96xf32> to vector<8x8x96xf32>
    %166 = arith.mulf %161, %165 : vector<8x8x96xf32>
    %167 = arith.addf %160, %166 : vector<8x8x96xf32>
    %168 = vector.extract_strided_slice %13 {offsets = [2, 0, 0], sizes = [8, 8, 96], strides = [1, 1, 1]} : vector<10x8x96xf32> to vector<8x8x96xf32>
    %c21 = arith.constant 21 : index
    %c0_82 = arith.constant 0 : index
    %c0_83 = arith.constant 0 : index
    %169 = vector.load %arg5[%c21, %c0_82, %c0_83] : memref<25x1x96xf32, #tpu.memory_space<vmem>>, vector<1x1x96xf32>
    %170 = vector.shape_cast %169 : vector<1x1x96xf32> to vector<1x96xf32>
    %171 = vector.shape_cast %170 : vector<1x96xf32> to vector<1x1x96xf32>
    %172 = vector.broadcast %171 : vector<1x1x96xf32> to vector<8x8x96xf32>
    %173 = arith.mulf %168, %172 : vector<8x8x96xf32>
    %174 = arith.addf %167, %173 : vector<8x8x96xf32>
    %175 = vector.extract_strided_slice %5 {offsets = [2, 0, 0], sizes = [8, 8, 96], strides = [1, 1, 1]} : vector<10x8x96xf32> to vector<8x8x96xf32>
    %c22 = arith.constant 22 : index
    %c0_84 = arith.constant 0 : index
    %c0_85 = arith.constant 0 : index
    %176 = vector.load %arg5[%c22, %c0_84, %c0_85] : memref<25x1x96xf32, #tpu.memory_space<vmem>>, vector<1x1x96xf32>
    %177 = vector.shape_cast %176 : vector<1x1x96xf32> to vector<1x96xf32>
    %178 = vector.shape_cast %177 : vector<1x96xf32> to vector<1x1x96xf32>
    %179 = vector.broadcast %178 : vector<1x1x96xf32> to vector<8x8x96xf32>
    %180 = arith.mulf %175, %179 : vector<8x8x96xf32>
    %181 = arith.addf %174, %180 : vector<8x8x96xf32>
    %182 = vector.extract_strided_slice %17 {offsets = [2, 0, 0], sizes = [8, 8, 96], strides = [1, 1, 1]} : vector<10x8x96xf32> to vector<8x8x96xf32>
    %c23 = arith.constant 23 : index
    %c0_86 = arith.constant 0 : index
    %c0_87 = arith.constant 0 : index
    %183 = vector.load %arg5[%c23, %c0_86, %c0_87] : memref<25x1x96xf32, #tpu.memory_space<vmem>>, vector<1x1x96xf32>
    %184 = vector.shape_cast %183 : vector<1x1x96xf32> to vector<1x96xf32>
    %185 = vector.shape_cast %184 : vector<1x96xf32> to vector<1x1x96xf32>
    %186 = vector.broadcast %185 : vector<1x1x96xf32> to vector<8x8x96xf32>
    %187 = arith.mulf %182, %186 : vector<8x8x96xf32>
    %188 = arith.addf %181, %187 : vector<8x8x96xf32>
    %189 = vector.extract_strided_slice %9 {offsets = [2, 0, 0], sizes = [8, 8, 96], strides = [1, 1, 1]} : vector<10x8x96xf32> to vector<8x8x96xf32>
    %c24 = arith.constant 24 : index
    %c0_88 = arith.constant 0 : index
    %c0_89 = arith.constant 0 : index
    %190 = vector.load %arg5[%c24, %c0_88, %c0_89] : memref<25x1x96xf32, #tpu.memory_space<vmem>>, vector<1x1x96xf32>
    %191 = vector.shape_cast %190 : vector<1x1x96xf32> to vector<1x96xf32>
    %192 = vector.shape_cast %191 : vector<1x96xf32> to vector<1x1x96xf32>
    %193 = vector.broadcast %192 : vector<1x1x96xf32> to vector<8x8x96xf32>
    %194 = arith.mulf %189, %193 : vector<8x8x96xf32>
    %195 = arith.addf %188, %194 : vector<8x8x96xf32>
    %196 = vector.shape_cast %195 : vector<8x8x96xf32> to vector<1x8x8x96xf32>
    %c0_90 = arith.constant 0 : index
    %c0_91 = arith.constant 0 : index
    %c0_92 = arith.constant 0 : index
    %c0_93 = arith.constant 0 : index
    %197 = vector.load %arg6[%c0_90, %c0_91, %c0_92, %c0_93] : memref<1x8x8x96xf32, #tpu.memory_space<vmem>>, vector<1x8x8x96xf32>
    tpu.vector_store %arg6[%c0_90, %c0_91, %c0_92, %c0_93], %196 {strides = array<i32>} : memref<1x8x8x96xf32, #tpu.memory_space<vmem>>, vector<1x8x8x96xf32>,
    %cst_94 = arith.constant dense<0.000000e+00> : vector<96xf32>
    %198 = vector.multi_reduction <add>, %195, %cst_94 [0, 1] : vector<8x8x96xf32> to vector<96xf32>
    %199 = vector.shape_cast %198 : vector<96xf32> to vector<1x1x96xf32>
    %200 = arith.mulf %195, %195 : vector<8x8x96xf32>
    %cst_95 = arith.constant dense<0.000000e+00> : vector<96xf32>
    %201 = vector.multi_reduction <add>, %200, %cst_95 [0, 1] : vector<8x8x96xf32> to vector<96xf32>
    %202 = vector.shape_cast %201 : vector<96xf32> to vector<1x1x96xf32>
    %203 = tpu.concatenate %199, %202 in 1 : vector<1x1x96xf32>, vector<1x1x96xf32> -> vector<1x2x96xf32>
    %c0_96 = arith.constant 0 : index
    %c0_97 = arith.constant 0 : index
    %c0_98 = arith.constant 0 : index
    %204 = vector.load %arg7[%c0_96, %c0_97, %c0_98] : memref<1x2x96xf32, #tpu.memory_space<vmem>>, vector<1x2x96xf32>
    tpu.vector_store %arg7[%c0_96, %c0_97, %c0_98], %203 {strides = array<i32>} : memref<1x2x96xf32, #tpu.memory_space<vmem>>, vector<1x2x96xf32>,
    return
  }
  func.func @transform_0(%arg0: i32) -> (i32, i32, i32, i32) {
    %c0_i32 = arith.constant 0 : i32
    %c0_i32_0 = arith.constant 0 : i32
    %c0_i32_1 = arith.constant 0 : i32
    %c0_i32_2 = arith.constant 0 : i32
    return %arg0, %c0_i32, %c0_i32_0, %c0_i32_1 : i32, i32, i32, i32
  }
  func.func @transform_1(%arg0: i32) -> (i32, i32, i32, i32) {
    %c0_i32 = arith.constant 0 : i32
    %c0_i32_0 = arith.constant 0 : i32
    %c0_i32_1 = arith.constant 0 : i32
    %c0_i32_2 = arith.constant 0 : i32
    return %arg0, %c0_i32, %c0_i32_0, %c0_i32_1 : i32, i32, i32, i32
  }
  func.func @transform_2(%arg0: i32) -> (i32, i32, i32, i32) {
    %c0_i32 = arith.constant 0 : i32
    %c0_i32_0 = arith.constant 0 : i32
    %c0_i32_1 = arith.constant 0 : i32
    %c0_i32_2 = arith.constant 0 : i32
    return %arg0, %c0_i32, %c0_i32_0, %c0_i32_1 : i32, i32, i32, i32
  }
  func.func @transform_3(%arg0: i32) -> (i32, i32, i32, i32) {
    %c0_i32 = arith.constant 0 : i32
    %c0_i32_0 = arith.constant 0 : i32
    %c0_i32_1 = arith.constant 0 : i32
    %c0_i32_2 = arith.constant 0 : i32
    return %arg0, %c0_i32, %c0_i32_0, %c0_i32_1 : i32, i32, i32, i32
  }
  func.func @transform_4(%arg0: i32) -> (i32, i32, i32) {
    %c0_i32 = arith.constant 0 : i32
    %c0_i32_0 = arith.constant 0 : i32
    %c0_i32_1 = arith.constant 0 : i32
    %c0_i32_2 = arith.constant 0 : i32
    return %c0_i32, %c0_i32_0, %c0_i32_1 : i32, i32, i32
  }
  func.func @transform_5(%arg0: i32) -> (i32, i32, i32, i32) {
    %c0_i32 = arith.constant 0 : i32
    %c0_i32_0 = arith.constant 0 : i32
    %c0_i32_1 = arith.constant 0 : i32
    %c0_i32_2 = arith.constant 0 : i32
    return %arg0, %c0_i32, %c0_i32_0, %c0_i32_1 : i32, i32, i32, i32
  }
  func.func @transform_6(%arg0: i32) -> (i32, i32, i32) {
    %c0_i32 = arith.constant 0 : i32
    %c0_i32_0 = arith.constant 0 : i32
    %c0_i32_1 = arith.constant 0 : i32
    return %arg0, %c0_i32, %c0_i32_0 : i32, i32, i32
  }
}

</mosaic_0001>

<bundles_post_ra>
// kernel: tpu_custom_call.1
= control target key start
LH: loop header
LB: loop body
LE: loop exit
PB: predicated region body
PF: predicated region fallthrough
CT: control target
= control target key end

     0   :  { %12 = vsyncpa [#allocation3], 0  ;;  %s2434_s0 = inlined_call_operand.vmem [shape: f32[2,10,10,96], index: 0, kind: input, shape index: {}]   ;;  %s2435_s1 = inlined_call_operand.vmem [shape: f32[2,10,10,96], index: 1, kind: input, shape index: {}]   ;;  %s2436_s2 = inlined_call_operand.vmem [shape: f32[2,10,10,96], index: 2, kind: input, shape index: {}]   ;;  %s2437_s3 = inlined_call_operand.vmem [shape: f32[2,10,10,96], index: 3, kind: input, shape index: {}]   ;;  %s2438_s4 = inlined_call_operand.vmem [shape: f32[25,1,96], index: 4, kind: input, shape index: {}]   ;;  %s2439_s5 = inlined_call_operand.hbm [shape: f32[2,8,8,96], index: 5, kind: output, shape index: {0}]   ;;  %s2440_s6 = inlined_call_operand.hbm [shape: f32[2,2,96], index: 6, kind: output, shape index: {1}]  }
   0x1   :  { %14 = vsyncpa [#allocation3 + $0x1], 0 }
   0x2   :  { %15 = vsyncpa [#allocation5], 0 }
   0x3   :  { %17 = vsyncpa [#allocation5 + $0x1], 0  ;;  %s1489_s21 = smov 0   ;;  %s1491_s22 = smov 0  }
   0x4   :  { %s1493_s23 = smov 0   ;;  %s1495_s24 = smov 0  }
   0x5 LB: > { %s1510_s25 = sadd.s32 4294967295, %s1448_s24   ;;  %s1240_s26 = sadd.s32 4294967294, %s1448_s24   ;;  %s1448_s24 = sphi %s1495_s24, %s2516_s24   ;;  %s1444_s23 = sphi %s1493_s23, %s2515_s23   ;;  %s1440_s22 = sphi %s1491_s22, %s2514_s22   ;;  %s1436_s21 = sphi %s1489_s21, %s2513_s21  }
   0x6   : > { %s1514_s27 = sadd.s32 1, %s1448_s24   ;;  %s155_s28 = sadd.s32 1, %s1444_s23 }
   0x7   : > { %s152_s29 = ssub.s32 %s1448_s24, %s1514_s27  ;;  %p165_p0 = scmp.ne.s32.totalorder %s1444_s23, %s1440_s22 }
   0x8   : > { %p153_p1 = scmp.eq.s32.totalorder %s152_s29, 0  ;;  %p166_p2 = scmp.eq.s32.totalorder %s1510_s25, 1 }
   0x9   : > { %p171_p3 = scmp.ne.s32.totalorder %s1440_s22, %s1436_s21  ;;  %p172_p4 = scmp.eq.s32.totalorder %s1240_s26, 1 }
   0xa   : > { %s1525_s30 = scalar_select %p153_p1, %s1444_s23, %s155_s28  }
   0xb   : > { %p1527_p5 = por %p166_p2, %p165_p0  ;;  %p1531_p6 = por %p172_p4, %p171_p3 }
   0xc   : > { %p1243_p7 = scmp.ge.s32.totalorder %s1448_s24, 1  ;;  %p251_p8 = scmp.lt.s32.totalorder %s1448_s24, 3 }
   0xe   : > { %p252_p9 = pnand %p1243_p7, %p251_p8 }
  0x10   : > { %255 = sbr.rel (%p252_p9) target bundleno = 202 (0xca), region = 40 }
  0x17   : > { %p301_p10 = scmp.lt.s32.totalorder %s1510_s25, 1  ;;  %v1542_v0 = vld [vmem:[%s2438_s4] ss:$0 sm:$0xff]  ;;  %v1552_v1 = vld [vmem:[%s2438_s4 + $0x2] ss:$0 sm:$0xff]  ;;  %s2060_s13 = sand.u32 1, %s1440_s22  }
  0x18   : > { %2455 = vst [vmem:[#allocation8_spill] sm:$0xff] %v1552_v1  ;;  %v1557_v2 = vld [vmem:[%s2438_s4 + $0x5] ss:$0 sm:$0xff]  ;;  %v1562_v3 = vld [vmem:[%s2438_s4 + $0xa] ss:$0 sm:$0xff]  ;;  %s1244_s14 = sshll.u32 %s2060_s13, 6 }
  0x19   : > { %s302_s9 = scalar_select %p301_p10, %s1510_s25, 1  ;;  %2456 = vst [vmem:[#allocation9_spill] sm:$0xff] %v1557_v2  ;;  %2457 = vst [vmem:[#allocation10_spill] sm:$0xff] %v1562_v3  ;;  %v1567_v4 = vld [vmem:[%s2438_s4 + $0xc] ss:$0 sm:$0xff]  ;;  %vm1015_vm0 = vcmask 785408  }
  0x1a   : > { %2458 = vst [vmem:[#allocation11_spill] sm:$0xff] %v1567_v4  ;;  %v1582_v8 = vld [vmem:[%s2438_s4 + $0x7] ss:$0 sm:$0xff]  ;;  %v1594_v12 = vld [vmem:[%s2438_s4 + $0x1] ss:$0 sm:$0xff]  ;;  %s2090_s16 = scalar_lea.vmem [#allocation2], %s1244_s14 }
  0x1b   : > { %s1307_s10 = smul.u32 160, %s302_s9  ;;  %v1599_v13 = vld [vmem:[%s2438_s4 + $0x4] ss:$0 sm:$0xff]  ;;  %v1618_v20 = vld [vmem:[%s2438_s4 + $0x9] ss:$0 sm:$0xff]  ;;  %s1079_s19 = scalar_lea.sflag [#allocation3], %s2060_s13 }
  0x1c   : > { %2459 = vst [vmem:[#allocation12_spill] sm:$0xff] %v1599_v13  ;;  %v1626_v22 = vld [vmem:[%s2438_s4 + $0xe] ss:$0 sm:$0xff]  ;;  %v1643_v26 = vld [vmem:[%s2438_s4 + $0x3] ss:$0 sm:$0xff]  ;;  %s1450_s20 = smov [#allocation2]  }
  0x1d   : > { %s1547_s15 = scalar_lea.vmem %s2434_s0, %s1307_s10  ;;  %s1572_s12 = scalar_lea.vmem %s2436_s2, %s1307_s10  ;;  %v1680_v41 = vld [vmem:[%s2438_s4 + $0x6] ss:$0 sm:$0xff]  ;;  %v1696_v45 = vld [vmem:[%s2438_s4 + $0xb] ss:$0 sm:$0xff]  ;;  %v1715_v54 = vld [vmem:[%s2438_s4 + $0x8] ss:$0 sm:$0xff] }
  0x1e   : > { %v321_v5 = vld [vmem:[%s1547_s15] sm:$0xff]  ;;  %v322_v6 = vld [vmem:[%s1547_s15 + $0x10] sm:$0xff]  ;;  %s1604_s28 = scalar_lea.vmem %s2435_s1, %s1307_s10  ;;  %s1631_s17 = scalar_lea.vmem %s2437_s3, %s1307_s10 }
  0x1f   : > { %v1577_v7 = vld [vmem:[%s1547_s15 + $0x20] sm:$0xff]  ;;  %v1586_v10 = vld [vmem:[%s1572_s12 + $0x10] sm:$0xff]  ;;  %v423_v17 = vmul.f32 %v1542_v0, %v321_v5  ;;  %v424_v18 = vmul.f32 %v1542_v0, %v322_v6  ;;  %v1621_v21 = vmul.f32 %v1562_v3, %v322_v6  ;;  %s1358_s26 = sshll.u32 %s1450_s20, 4  ;;  %s1359_s26 = int_to_ptr.vmem [resolvable:$false] %s1358_s26 }
  0x20   : > { %v331_v9 = vld [vmem:[%s1572_s12] sm:$0xff]  ;;  %v341_v15 = vld [vmem:[%s1547_s15 + $0x11] sm:$0xff]  ;;  %v425_v19 = vmul.f32 %v1542_v0, %v1577_v7  ;;  %v1650_v28 = vmul.f32 %v1557_v2, %v1586_v10  ;;  %v1658_v30 = vmul.f32 %v1562_v3, %v1577_v7  ;;  %s1360_s29 = scalar_lea.vmem %s1359_s26, 2048 }
  0x21   : > { %v1589_v11 = vld [vmem:[%s1572_s12 + $0x20] sm:$0xff]  ;;  %v1635_v24 = vld [vmem:[%s1572_s12 + $0x11] sm:$0xff]  ;;  %v1646_v27 = vmul.f32 %v1557_v2, %v331_v9  ;;  %v472_v35 = vmul.f32 %v1552_v1, %v341_v15  ;;  %v1670_v37 = vmul.f32 %v1567_v4, %v341_v15 }
  0x22   : > { %v340_v14 = vld [vmem:[%s1547_s15 + $0x1] sm:$0xff]  ;;  %v1654_v29 = vmul.f32 %v1557_v2, %v1589_v11  ;;  %v360_v32 = vld [vmem:[%s1547_s15 + $0x12] sm:$0xff]  ;;  %v1687_v43 = vmul.f32 %v1582_v8, %v1635_v24 }
  0x23   : > { %v1609_v16 = vld [vmem:[%s1547_s15 + $0x21] sm:$0xff]  ;;  %v471_v34 = vmul.f32 %v1552_v1, %v340_v14  ;;  %2460 = vst [vmem:[#allocation13_spill] sm:$0xff] %v1670_v37  ;;  %v1674_v39 = vld [vmem:[%s1572_s12 + $0x12] sm:$0xff]  ;;  %v520_v52 = vmul.f32 %v1599_v13, %v360_v32  ;;  %v1727_v61 = vmul.f32 %v1626_v22, %v360_v32 }
  0x24   : > { %v350_v23 = vld [vmem:[%s1572_s12 + $0x1] sm:$0xff]  ;;  %v473_v36 = vmul.f32 %v1552_v1, %v1609_v16  ;;  %v1700_v46 = vmul.f32 %v1567_v4, %v1609_v16  ;;  %v379_v47 = vld [vmem:[%s1604_s28 + $0x10] sm:$0xff]  ;;  %v1737_v14 = vmul.f32 %v1618_v20, %v1674_v39 }
  0x25   : > { %v1638_v25 = vld [vmem:[%s1572_s12 + $0x21] sm:$0xff]  ;;  %v1683_v42 = vmul.f32 %v1582_v8, %v350_v23  ;;  %v389_v55 = vld [vmem:[%s1631_s17 + $0x10] sm:$0xff]  ;;  %v448_v58 = vmul.f32 %v1594_v12, %v379_v47  ;;  %2462 = vst [vmem:[#allocation15_spill] sm:$0xff] %v1727_v61 }
  0x26   : > { %v359_v31 = vld [vmem:[%s1547_s15 + $0x2] sm:$0xff]  ;;  %v1691_v44 = vmul.f32 %v1582_v8, %v1638_v25  ;;  %2461 = vst [vmem:[#allocation14_spill] sm:$0xff] %v1700_v46  ;;  %v398_v62 = vld [vmem:[%s1604_s28 + $0x11] sm:$0xff]  ;;  %v568_v61 = vmul.f32 %v1680_v41, %v389_v55 }
  0x27   : > { %v1663_v33 = vld [vmem:[%s1547_s15 + $0x22] sm:$0xff]  ;;  %v519_v51 = vmul.f32 %v1599_v13, %v359_v31  ;;  %v408_v23 = vld [vmem:[%s1631_s17 + $0x11] sm:$0xff]  ;;  %v456_v31 = vadd.f32 %v448_v58, %v424_v18  ;;  %v496_v32 = vmul.f32 %v1643_v26, %v398_v62  ;;  %v1760_v18 = vld [vmem:[%s2438_s4 + $0xf] ss:$0 sm:$0xff] }
  0x28   : > { %v369_v38 = vld [vmem:[%s1572_s12 + $0x2] sm:$0xff]  ;;  %v521_v53 = vmul.f32 %v1599_v13, %v1663_v33  ;;  %v1741_v15 = vmul.f32 %v1626_v22, %v1663_v33 }
  0x29   : > { %v378_v40 = vld [vmem:[%s1604_s28] sm:$0xff]  ;;  %v1724_v60 = vmul.f32 %v1618_v20, %v369_v38 }
  0x2a   : > { %v1704_v48 = vld [vmem:[%s1604_s28 + $0x20] sm:$0xff]  ;;  %v447_v50 = vmul.f32 %v1594_v12, %v378_v40  ;;  %2463 = vst [vmem:[#allocation16_spill] sm:$0xff] %v1741_v15  ;;  %v1755_v15 = vmul.f32 %v1696_v45, %v379_v47  ;;  %v616_v47 = vmul.f32 %v1715_v54, %v408_v23 }
  0x2b   : > { %v388_v49 = vld [vmem:[%s1631_s17] sm:$0xff]  ;;  %v449_v59 = vmul.f32 %v1594_v12, %v1704_v48 }
  0x2c   : > { %v390_v56 = vld [vmem:[%s1631_s17 + $0x20] sm:$0xff]  ;;  %v455_v6 = vadd.f32 %v447_v50, %v423_v17  ;;  %v1750_v17 = vld [vmem:[%s2438_s4 + $0xd] ss:$0 sm:$0xff] }
  0x2d   : > { %v397_v57 = vld [vmem:[%s1604_s28 + $0x1] sm:$0xff]  ;;  %v457_v38 = vadd.f32 %v449_v59, %v425_v19  ;;  %v480_v19 = vadd.f32 %v472_v35, %v456_v31  ;;  %v569_v59 = vmul.f32 %v1680_v41, %v390_v56  ;;  %v1775_v35 = vmul.f32 %v1750_v17, %v398_v62 }
  0x2e   : > { %v1731_v63 = vld [vmem:[%s1604_s28 + $0x21] sm:$0xff]  ;;  %v495_v9 = vmul.f32 %v1643_v26, %v397_v57  ;;  %v479_v50 = vadd.f32 %v471_v34, %v455_v6  ;;  %v567_v57 = vmul.f32 %v1680_v41, %v388_v49  ;;  %v1767_v34 = vld [vmem:[%s2438_s4 + $0x10] ss:$0 sm:$0xff]  ;;  %v1772_v6 = vmul.f32 %v1696_v45, %v1704_v48 }
  0x2f   : > { %v407_v5 = vld [vmem:[%s1631_s17 + $0x1] sm:$0xff]  ;;  %v497_v40 = vmul.f32 %v1643_v26, %v1731_v63  ;;  %v481_v58 = vadd.f32 %v473_v36, %v457_v38  ;;  %2465 = vst [vmem:[#allocation18_spill] sm:$0xff] %v1775_v35  ;;  %v1780_v36 = vld [vmem:[%s2438_s4 + $0x11] ss:$0 sm:$0xff]  ;;  %v1789_v38 = vmul.f32 %v1750_v17, %v1731_v63  ;;  %v1793_v62 = vmul.f32 %v1760_v18, %v1586_v10  ;;  %v1803_v35 = vld [vmem:[%s2438_s4 + $0x14] ss:$0 sm:$0xff] }
  0x30   : > { %v615_v46 = vmul.f32 %v1715_v54, %v407_v5  ;;  %v503_v49 = vadd.f32 %v495_v9, %v479_v50  ;;  %2464 = vst [vmem:[#allocation17_spill] sm:$0xff] %v1772_v6  ;;  %v1785_v5 = vld [vmem:[%s2438_s4 + $0x12] ss:$0 sm:$0xff]  ;;  %v504_v9 = vadd.f32 %v496_v32, %v480_v19  ;;  %v1798_v50 = vld [vmem:[%s2438_s4 + $0x13] ss:$0 sm:$0xff]  ;;  %v1810_v19 = vmul.f32 %v1760_v18, %v1589_v11 }
  0x31   : > { %v505_v31 = vadd.f32 %v497_v40, %v481_v58  ;;  %2466 = vst [vmem:[#allocation19_spill] sm:$0xff] %v1789_v38  ;;  %2467 = vst [vmem:[#allocation20_spill] sm:$0xff] %v1793_v62  ;;  %v1806_v32 = vld [vmem:[%s1547_s15 + $0x30] sm:$0xff]  ;;  %v1813_v10 = vmul.f32 %v1767_v34, %v389_v55  ;;  %v1816_v58 = vmul.f32 %v1767_v34, %v390_v56 }
  0x32   : > { %v527_v40 = vadd.f32 %v519_v51, %v503_v49  ;;  %2468 = vst [vmem:[#allocation21_spill] sm:$0xff] %v1810_v19  ;;  %v1819_v62 = vld [vmem:[%s1547_s15 + $0x31] sm:$0xff]  ;;  %v528_v37 = vadd.f32 %v520_v52, %v504_v9  ;;  %v1826_v51 = vmul.f32 %v1780_v36, %v1635_v24  ;;  %v1829_v11 = vmul.f32 %v1785_v5, %v408_v23 }
  0x33   : > { %2469 = vst [vmem:[#allocation22_spill] sm:$0xff] %v1813_v10  ;;  %2470 = vst [vmem:[#allocation23_spill] sm:$0xff] %v1816_v58  ;;  %v1822_v38 = vld [vmem:[%s1604_s28 + $0x30] sm:$0xff]  ;;  %v529_v6 = vadd.f32 %v521_v53, %v505_v31  ;;  %v1849_v53 = vmul.f32 %v1798_v50, %v1674_v39  ;;  %v1853_v23 = vmul.f32 %v1803_v35, %v1577_v7  ;;  %v1865_v39 = vld [vmem:[%s2438_s4 + $0x18] ss:$0 sm:$0xff] }
  0x34   : > { %2471 = vst [vmem:[#allocation24_spill] sm:$0xff] %v1826_v51  ;;  %2472 = vst [vmem:[#allocation25_spill] sm:$0xff] %v1829_v11  ;;  %v1834_v55 = vld [vmem:[%s2438_s4 + $0x15] ss:$0 sm:$0xff]  ;;  %v1839_v56 = vld [vmem:[%s2438_s4 + $0x16] ss:$0 sm:$0xff]  ;;  %v551_v24 = vadd.f32 %v1646_v27, %v527_v40  ;;  %v426_v9 = vmul.f32 %v1542_v0, %v1806_v32  ;;  %v552_v31 = vadd.f32 %v1650_v28, %v528_v37 }
  0x35   : > { %v1844_v52 = vld [vmem:[%s2438_s4 + $0x17] ss:$0 sm:$0xff]  ;;  %2473 = vst [vmem:[#allocation26_spill] sm:$0xff] %v1849_v53  ;;  %2474 = vst [vmem:[#allocation27_spill] sm:$0xff] %v1853_v23  ;;  %v553_v27 = vadd.f32 %v1654_v29, %v529_v6  ;;  %v409_v7 = vld [vmem:[%s1631_s17 + $0x21] sm:$0xff]  ;;  %v450_v23 = vmul.f32 %v1594_v12, %v1822_v38  ;;  %v474_v53 = vmul.f32 %v1552_v1, %v1819_v62 }
  0x36   : > { %v1856_v49 = vld [vmem:[%s1604_s28 + $0x31] sm:$0xff]  ;;  %2475 = vst [vmem:[#allocation28_spill] sm:$0xff] %v1865_v39  ;;  %v575_v11 = vadd.f32 %v567_v57, %v551_v24  ;;  %v1877_v28 = vmul.f32 %v1834_v55, %v1704_v48  ;;  %v1881_v29 = vmul.f32 %v1839_v56, %v1609_v16  ;;  %v1885_v37 = vmul.f32 %v1844_v52, %v1731_v63  ;;  %v371_v6 = vld [vmem:[%s1572_s12 + $0x22] sm:$0xff] }
  0x37   : > { %v1868_v40 = vld [vmem:[%s1547_s15 + $0x32] sm:$0xff]  ;;  %v576_v51 = vadd.f32 %v568_v61, %v552_v31  ;;  %v577_v58 = vadd.f32 %v569_v59, %v553_v27  ;;  %v458_v57 = vadd.f32 %v450_v23, %v426_v9  ;;  %v498_v48 = vmul.f32 %v1643_v26, %v1856_v49 }
  0x38   : > { %2476 = vst [vmem:[#allocation29_spill] sm:$0xff] %v1877_v28  ;;  %2477 = vst [vmem:[#allocation30_spill] sm:$0xff] %v1881_v29  ;;  %v334_v10 = vld [vmem:[%s1572_s12 + $0x30] sm:$0xff]  ;;  %v599_v24 = vadd.f32 %v1683_v42, %v575_v11  ;;  %v1898_v16 = vmul.f32 %v1865_v39, %v1663_v33  ;;  %v522_v63 = vmul.f32 %v1599_v13, %v1868_v40 }
  0x39   : > { %2478 = vst [vmem:[#allocation31_spill] sm:$0xff] %v1885_v37  ;;  %v1890_v19 = vld [vmem:[%s1572_s12 + $0x31] sm:$0xff]  ;;  %v617_v61 = vmul.f32 %v1715_v54, %v409_v7  ;;  %v600_v59 = vadd.f32 %v1687_v43, %v576_v51  ;;  %v601_v31 = vadd.f32 %v1691_v44, %v577_v58  ;;  %v482_v27 = vadd.f32 %v474_v53, %v458_v57 }
  0x3a   : > { %v391_v1 = vld [vmem:[%s1631_s17 + $0x30] sm:$0xff]  ;;  %2479 = vst [vmem:[#allocation32_spill] sm:$0xff] %v1898_v16  ;;  %v641_v23 = vmul.f32 %v1618_v20, %v371_v6  ;;  %v623_v9 = vadd.f32 %v615_v46, %v599_v24  ;;  %v546_v42 = vmul.f32 %v1557_v2, %v334_v10  ;;  %v594_v33 = vmul.f32 %v1582_v8, %v1890_v19  ;;  %v1923_v24 = vld [vmem:[%s1547_s15 + $0x40] sm:$0xff] }
  0x3b   : > { %v570_v11 = vmul.f32 %v1680_v41, %v391_v1  ;;  %v624_v16 = vadd.f32 %v616_v47, %v600_v59  ;;  %v506_v37 = vadd.f32 %v498_v48, %v482_v27  ;;  %v625_v29 = vadd.f32 %v617_v61, %v601_v31  ;;  %v1933_v27 = vld [vmem:[%s1604_s28 + $0x40] sm:$0xff] }
  0x3c   : > { %v665_v43 = vmul.f32 %v1562_v3, %v1806_v32  ;;  %v647_v44 = vadd.f32 %v1724_v60, %v623_v9  ;;  %v689_v46 = vmul.f32 %v1696_v45, %v1822_v38  ;;  %v713_v58 = vmul.f32 %v1567_v4, %v1819_v62 }
  0x3d   : > { %v737_v51 = vmul.f32 %v1750_v17, %v1856_v49  ;;  %v648_v47 = vadd.f32 %v1737_v14, %v624_v16  ;;  %v530_v53 = vadd.f32 %v522_v63, %v506_v37  ;;  %v649_v57 = vadd.f32 %v641_v23, %v625_v29 }
  0x3e   : > { %v761_v48 = vmul.f32 %v1626_v22, %v1868_v40  ;;  %v671_v60 = vadd.f32 %v1621_v21, %v647_v44  ;;  %v785_v61 = vmul.f32 %v1760_v18, %v334_v10  ;;  %v809_v59 = vmul.f32 %v1767_v34, %v391_v1  ;;  %v1940_v21 = vld [vmem:[%s1547_s15 + $0x41] sm:$0xff] }
  0x3f   : > { %v1930_v31 = vmul.f32 %v1780_v36, %v1638_v25  ;;  %v672_v14 = vadd.f32 %v1658_v30, %v648_v47  ;;  %v554_v29 = vadd.f32 %v546_v42, %v530_v53  ;;  %v673_v37 = vadd.f32 %v665_v43, %v649_v57  ;;  %v1943_v10 = vld [vmem:[%s1604_s28 + $0x41] sm:$0xff] }
  0x40   : > { %v1937_v16 = vmul.f32 %v1785_v5, %v409_v7  ;;  %v695_v1 = vadd.f32 %v1755_v15, %v671_v60  ;;  %v1947_v63 = vmul.f32 %v1798_v50, %v371_v6  ;;  %v1951_v25 = vmul.f32 %v1803_v35, %v1806_v32  ;;  %v2481_v7 = vld [vmem:[#allocation17_spill] sm:$0xff]  ;;  %v1957_v43 = vld [vmem:[%s1547_s15 + $0x42] sm:$0xff] }
  0x41   : > { %v427_v30 = vmul.f32 %v1542_v0, %v1923_v24  ;;  %v696_v23 = vadd.f32 %v2481_v7, %v672_v14  ;;  %v578_v9 = vadd.f32 %v570_v11, %v554_v29  ;;  %v697_v42 = vadd.f32 %v689_v46, %v673_v37  ;;  %v2482_v6 = vld [vmem:[#allocation13_spill] sm:$0xff]  ;;  %v2484_v53 = vld [vmem:[#allocation8_spill] sm:$0xff]  ;;  %v2485_v46 = vld [vmem:[#allocation14_spill] sm:$0xff] }
  0x42   : > { %2480 = vst [vmem:[#allocation33_spill] sm:$0xff] %v1951_v25  ;;  %v451_v15 = vmul.f32 %v1594_v12, %v1933_v27  ;;  %v719_v44 = vadd.f32 %v2482_v6, %v695_v1  ;;  %v1964_v47 = vmul.f32 %v1834_v55, %v1822_v38  ;;  %v410_v32 = vld [vmem:[%s1631_s17 + $0x31] sm:$0xff]  ;;  %v475_v57 = vmul.f32 %v2484_v53, %v1940_v21  ;;  %v335_v37 = vld [vmem:[%s1572_s12 + $0x40] sm:$0xff] }
  0x43   : > { %v499_v11 = vmul.f32 %v1643_v26, %v1943_v10  ;;  %v720_v60 = vadd.f32 %v2485_v46, %v696_v23  ;;  %v602_v14 = vadd.f32 %v594_v33, %v578_v9  ;;  %v721_v29 = vadd.f32 %v713_v58, %v697_v42  ;;  %v372_v7 = vld [vmem:[%s1572_s12 + $0x32] sm:$0xff]  ;;  %v2489_v23 = vld [vmem:[#allocation19_spill] sm:$0xff] }
  0x44   : > { %2483 = vst [vmem:[#allocation17_spill] sm:$0xff] %v1964_v47  ;;  %v459_v28 = vadd.f32 %v451_v15, %v427_v30  ;;  %v2486_v1 = vld [vmem:[#allocation18_spill] sm:$0xff]  ;;  %v1977_v38 = vmul.f32 %v1839_v56, %v1819_v62  ;;  %v1981_v47 = vmul.f32 %v1844_v52, %v1856_v49  ;;  %v523_v25 = vmul.f32 %v1599_v13, %v1957_v43  ;;  %v392_v9 = vld [vmem:[%s1631_s17 + $0x40] sm:$0xff] }
  0x45   : > { %v743_v6 = vadd.f32 %v2486_v1, %v719_v44  ;;  %v744_v33 = vadd.f32 %v2489_v23, %v720_v60  ;;  %v745_v58 = vadd.f32 %v737_v51, %v721_v29  ;;  %v618_v30 = vmul.f32 %v1715_v54, %v410_v32  ;;  %v2490_v15 = vld [vmem:[#allocation15_spill] sm:$0xff]  ;;  %v2491_v1 = vld [vmem:[#allocation16_spill] sm:$0xff] }
  0x46   : > { %2487 = vst [vmem:[#allocation13_spill] sm:$0xff] %v1977_v38  ;;  %2488 = vst [vmem:[#allocation8_spill] sm:$0xff] %v1981_v47  ;;  %v483_v42 = vadd.f32 %v475_v57, %v459_v28  ;;  %v547_v46 = vmul.f32 %v1557_v2, %v335_v37  ;;  %v642_v62 = vmul.f32 %v1618_v20, %v372_v7  ;;  %v1995_v13 = vld [vmem:[%s1572_s12 + $0x41] sm:$0xff] }
  0x47   : > { %v767_v44 = vadd.f32 %v2490_v15, %v743_v6  ;;  %v666_v49 = vmul.f32 %v1562_v3, %v1923_v24  ;;  %v768_v47 = vadd.f32 %v2491_v1, %v744_v33  ;;  %v769_v38 = vadd.f32 %v761_v48, %v745_v58  ;;  %v2492_v29 = vld [vmem:[#allocation20_spill] sm:$0xff]  ;;  %v2493_v15 = vld [vmem:[#allocation21_spill] sm:$0xff]  ;;  %v2494_v58 = vld [vmem:[#allocation22_spill] sm:$0xff] }
  0x48   : > { %v507_v60 = vadd.f32 %v499_v11, %v483_v42  ;;  %v626_v51 = vadd.f32 %v618_v30, %v602_v14  ;;  %v2000_v57 = vmul.f32 %v1865_v39, %v1868_v40  ;;  %v571_v6 = vmul.f32 %v1680_v41, %v392_v9  ;;  %v2495_v42 = vld [vmem:[#allocation23_spill] sm:$0xff] }
  0x49   : > { %v791_v28 = vadd.f32 %v2492_v29, %v767_v44  ;;  %v690_v23 = vmul.f32 %v1696_v45, %v1933_v27  ;;  %v792_v2 = vadd.f32 %v2493_v15, %v768_v47  ;;  %v793_v3 = vadd.f32 %v785_v61, %v769_v38 }
  0x4a   : > { %v531_v33 = vadd.f32 %v523_v25, %v507_v60  ;;  %v650_v48 = vadd.f32 %v642_v62, %v626_v51  ;;  %v595_v11 = vmul.f32 %v1582_v8, %v1995_v13  ;;  %v714_v40 = vmul.f32 %v1567_v4, %v1940_v21  ;;  %v2496_v25 = vld [vmem:[#allocation24_spill] sm:$0xff] }
  0x4b   : > { %v815_v1 = vadd.f32 %v2494_v58, %v791_v28  ;;  %v833_v14 = vmul.f32 %v1780_v36, %v1890_v19  ;;  %v816_v30 = vadd.f32 %v2495_v42, %v792_v2  ;;  %v817_v44 = vadd.f32 %v809_v59, %v793_v3  ;;  %v2023_v3 = vld [vmem:[%s1547_s15 + $0x50] sm:$0xff] }
  0x4c   : > { %v555_v47 = vadd.f32 %v547_v46, %v531_v33  ;;  %v674_v61 = vadd.f32 %v666_v49, %v650_v48  ;;  %v738_v62 = vmul.f32 %v1750_v17, %v1943_v10  ;;  %v762_v60 = vmul.f32 %v1626_v22, %v1957_v43  ;;  %v2026_v59 = vld [vmem:[%s1604_s28 + $0x50] sm:$0xff] }
  0x4d   : > { %v839_v38 = vadd.f32 %v2496_v25, %v815_v1  ;;  %v857_v51 = vmul.f32 %v1785_v5, %v410_v32  ;;  %v840_v29 = vadd.f32 %v1930_v31, %v816_v30  ;;  %v841_v28 = vadd.f32 %v833_v14, %v817_v44  ;;  %v2497_v46 = vld [vmem:[#allocation25_spill] sm:$0xff]  ;;  %v2498_v14 = vld [vmem:[#allocation26_spill] sm:$0xff]  ;;  %v411_v25 = vld [vmem:[%s1631_s17 + $0x41] sm:$0xff] }
  0x4e   : > { %v698_v19 = vadd.f32 %v690_v23, %v674_v61  ;;  %v881_v2 = vmul.f32 %v1798_v50, %v372_v7  ;;  %v786_v15 = vmul.f32 %v1760_v18, %v335_v37  ;;  %v810_v33 = vmul.f32 %v1767_v34, %v392_v9  ;;  %v2034_v48 = vld [vmem:[%s1547_s15 + $0x51] sm:$0xff] }
  0x4f   : > { %v863_v49 = vadd.f32 %v2497_v46, %v839_v38  ;;  %v905_v32 = vmul.f32 %v1803_v35, %v1923_v24  ;;  %v864_v31 = vadd.f32 %v1937_v16, %v840_v29  ;;  %v579_v7 = vadd.f32 %v571_v6, %v555_v47  ;;  %v2038_v1 = vld [vmem:[%s1604_s28 + $0x51] sm:$0xff]  ;;  %v2499_v47 = vld [vmem:[#allocation27_spill] sm:$0xff] }
  0x50   : > { %v722_v23 = vadd.f32 %v714_v40, %v698_v19  ;;  %v865_v58 = vadd.f32 %v857_v51, %v841_v28  ;;  %v929_v37 = vmul.f32 %v1834_v55, %v1933_v27  ;;  %v428_v9 = vmul.f32 %v1542_v0, %v2023_v3  ;;  %v2049_v30 = vld [vmem:[%s1547_s15 + $0x52] sm:$0xff] }
  0x51   : > { %v887_v42 = vadd.f32 %v2498_v14, %v863_v49  ;;  %v452_v24 = vmul.f32 %v1594_v12, %v2026_v59  ;;  %v888_v16 = vadd.f32 %v1947_v63, %v864_v31  ;;  %v476_v44 = vmul.f32 %v2484_v53, %v2034_v48  ;;  %v2500_v63 = vld [vmem:[#allocation33_spill] sm:$0xff] }
  0x52   : > { %v746_v6 = vadd.f32 %v738_v62, %v722_v23  ;;  %v889_v40 = vadd.f32 %v881_v2, %v865_v58  ;;  %v953_v27 = vmul.f32 %v1839_v56, %v1940_v21  ;;  %v500_v51 = vmul.f32 %v1643_v26, %v2038_v1  ;;  %v373_v2 = vld [vmem:[%s1572_s12 + $0x42] sm:$0xff]  ;;  %v2501_v46 = vld [vmem:[#allocation29_spill] sm:$0xff] }
  0x53   : > { %v911_v61 = vadd.f32 %v2499_v47, %v887_v42  ;;  %v460_v38 = vadd.f32 %v452_v24, %v428_v9  ;;  %v912_v62 = vadd.f32 %v2500_v63, %v888_v16  ;;  %v603_v29 = vadd.f32 %v595_v11, %v579_v7  ;;  %v2502_v23 = vld [vmem:[#allocation12_spill] sm:$0xff]  ;;  %v2503_v14 = vld [vmem:[#allocation17_spill] sm:$0xff]  ;;  %v2507_v63 = vld [vmem:[#allocation31_spill] sm:$0xff] }
  0x54   : > { %v770_v19 = vadd.f32 %v762_v60, %v746_v6  ;;  %v913_v28 = vadd.f32 %v905_v32, %v889_v40  ;;  %v977_v21 = vmul.f32 %v1844_v52, %v1943_v10  ;;  %v524_v58 = vmul.f32 %v2502_v23, %v2049_v30  ;;  %v336_v16 = vld [vmem:[%s1572_s12 + $0x50] sm:$0xff] }
  0x55   : > { %v935_v49 = vadd.f32 %v2501_v46, %v911_v61  ;;  %v484_v31 = vadd.f32 %v476_v44, %v460_v38  ;;  %v936_v42 = vadd.f32 %v2503_v14, %v912_v62  ;;  %v1001_v24 = vmul.f32 %v1865_v39, %v1957_v43  ;;  %v2504_v60 = vld [vmem:[#allocation30_spill] sm:$0xff]  ;;  %v2505_v40 = vld [vmem:[#allocation13_spill] sm:$0xff]  ;;  %v2509_v14 = vld [vmem:[#allocation8_spill] sm:$0xff] }
  0x56   : > { %v937_v9 = vadd.f32 %v929_v37, %v913_v28  ;;  %v619_v11 = vmul.f32 %v1715_v54, %v411_v25  ;;  %v794_v7 = vadd.f32 %v786_v15, %v770_v19  ;;  %v643_v10 = vmul.f32 %v1618_v20, %v373_v2  ;;  %v2506_v37 = vld [vmem:[#allocation10_spill] sm:$0xff]  ;;  %v2508_v28 = vld [vmem:[#allocation9_spill] sm:$0xff]  ;;  %v2510_v19 = vld [vmem:[#allocation32_spill] sm:$0xff] }
  0x57   : > { %v959_v32 = vadd.f32 %v2504_v60, %v935_v49  ;;  %v508_v6 = vadd.f32 %v500_v51, %v484_v31  ;;  %v960_v44 = vadd.f32 %v2505_v40, %v936_v42  ;;  %v667_v38 = vmul.f32 %v2506_v37, %v2023_v3  ;;  %v393_v15 = vld [vmem:[%s1631_s17 + $0x50] sm:$0xff] }
  0x58   : > { %v961_v47 = vadd.f32 %v953_v27, %v937_v9  ;;  %v627_v61 = vadd.f32 %v619_v11, %v603_v29  ;;  %v548_v46 = vmul.f32 %v2508_v28, %v336_v16  ;;  %v691_v27 = vmul.f32 %v1696_v45, %v2026_v59 }
  0x59   : > { %v983_v43 = vadd.f32 %v2507_v63, %v959_v32  ;;  %v532_v62 = vadd.f32 %v524_v58, %v508_v6  ;;  %v984_v39 = vadd.f32 %v2509_v14, %v960_v44  ;;  %v818_v42 = vadd.f32 %v810_v33, %v794_v7 }
  0x5a   : > { %v985_v49 = vadd.f32 %v977_v21, %v961_v47  ;;  %v651_v51 = vadd.f32 %v643_v10, %v627_v61  ;;  %v2095_v21 = vld [vmem:[%s1572_s12 + $0x51] sm:$0xff]  ;;  %v572_v60 = vmul.f32 %v1680_v41, %v393_v15  ;;  %v858_v6 = vmul.f32 %v1785_v5, %v411_v25  ;;  %v2116_v47 = vld [vmem:[%s1547_s15 + $0x60] sm:$0xff] }
  0x5b   : > { %v1007_v31 = vadd.f32 %v2510_v19, %v983_v43  ;;  %v1008_v29 = vadd.f32 %v2000_v57, %v984_v39  ;;  %v556_v58 = vadd.f32 %v548_v46, %v532_v62  ;;  %v715_v39 = vmul.f32 %v1567_v4, %v2034_v48  ;;  %v2119_v61 = vld [vmem:[%s1547_s15 + $0x61] sm:$0xff] }
  0x5c   : > { %v2088_v9 = vadd.f32 %v1001_v24, %v985_v49  ;;  %v675_v11 = vadd.f32 %v667_v38, %v651_v51  ;;  %v834_v57 = vmul.f32 %v1780_v36, %v1995_v13  ;;  %v739_v24 = vmul.f32 %v1750_v17, %v2038_v1  ;;  %v2122_v38 = vld [vmem:[%s1604_s28 + $0x60] sm:$0xff] }
  0x5d   : > { %1016 = vst.msk [vmem:[%s2090_s16] sm:$0xff] %vm1015_vm0, %v1007_v31  ;;  %1017 = vst.msk [vmem:[%s2090_s16 + $0x8] sm:$0xff] %vm1015_vm0, %v1008_v29  ;;  %v596_v32 = vmul.f32 %v1582_v8, %v2095_v21  ;;  %v580_v10 = vadd.f32 %v572_v60, %v556_v58  ;;  %v763_v13 = vmul.f32 %v1626_v22, %v2049_v30  ;;  %v2129_v46 = vsel %vm1015_vm0, %v1007_v31, 0.0  ;;  %v2134_v51 = vld [vmem:[%s1604_s28 + $0x61] sm:$0xff] }
  0x5e   : > { %1018 = vst.msk [vmem:[%s2090_s16 + $0x10] sm:$0xff] %vm1015_vm0, %v2088_v9  ;;  %v699_v33 = vadd.f32 %v691_v27, %v675_v11  ;;  %v842_v7 = vadd.f32 %v834_v57, %v818_v42  ;;  %v882_v44 = vmul.f32 %v1798_v50, %v373_v2  ;;  %v787_v63 = vmul.f32 %v1760_v18, %v336_v16  ;;  %v374_v27 = vld [vmem:[%s1572_s12 + $0x52] sm:$0xff]  ;;  %v2150_v60 = vld [vmem:[%s1547_s15 + $0x62] sm:$0xff] }
  0x5f   : > { %v811_v25 = vmul.f32 %v1767_v34, %v393_v15  ;;  %v906_v62 = vmul.f32 %v1803_v35, %v2023_v3  ;;  %v1045_v14 = vmul.f32 %v1007_v31, %v1007_v31  ;;  %v930_v49 = vmul.f32 %v1834_v55, %v2026_v59  ;;  %v412_v16 = vld [vmem:[%s1631_s17 + $0x51] sm:$0xff] }
  0x60   : > { %v723_v40 = vadd.f32 %v715_v39, %v699_v33  ;;  %v866_v43 = vadd.f32 %v858_v6, %v842_v7  ;;  %v429_v15 = vmul.f32 %v1542_v0, %v2116_v47  ;;  %v453_v3 = vmul.f32 %v1594_v12, %v2122_v38 }
  0x61   : > { %v477_v31 = vmul.f32 %v2484_v53, %v2119_v61  ;;  %v2145_v42 = vsel %vm1015_vm0, %v1008_v29, 0.0  ;;  %v2147_v59 = vmul.f32 %v1008_v29, %v1008_v29  ;;  %v604_v11 = vadd.f32 %v596_v32, %v580_v10  ;;  %v337_v29 = vld [vmem:[%s1572_s12 + $0x60] sm:$0xff] }
  0x62   : > { %v747_v2 = vadd.f32 %v739_v24, %v723_v40  ;;  %v890_v19 = vadd.f32 %v882_v44, %v866_v43  ;;  %v954_v57 = vmul.f32 %v1839_v56, %v2034_v48  ;;  %v461_v33 = vadd.f32 %v453_v3, %v429_v15  ;;  %v394_v40 = vld [vmem:[%s1631_s17 + $0x60] sm:$0xff] }
  0x63   : > { %v501_v24 = vmul.f32 %v1643_v26, %v2134_v51  ;;  %v2158_v7 = vmul.f32 %v2088_v9, %v2088_v9  ;;  %v620_v32 = vmul.f32 %v1715_v54, %v412_v16  ;;  %v644_v10 = vmul.f32 %v1618_v20, %v374_v27 }
  0x64   : > { %v771_v58 = vadd.f32 %v763_v13, %v747_v2  ;;  %v914_v39 = vadd.f32 %v906_v62, %v890_v19  ;;  %v978_v44 = vmul.f32 %v1844_v52, %v2038_v1  ;;  %v485_v48 = vadd.f32 %v477_v31, %v461_v33  ;;  %v2511_v2 = vld [vmem:[#allocation28_spill] sm:$0xff]  ;;  %v2183_v33 = vld [vmem:[%s1547_s15 + $0x70] sm:$0xff] }
  0x65   : > { %v525_v43 = vmul.f32 %v2502_v23, %v2150_v60  ;;  %v1002_v19 = vmul.f32 %v2511_v2, %v2049_v30  ;;  %v628_v15 = vadd.f32 %v620_v32, %v604_v11  ;;  %v549_v1 = vmul.f32 %v2508_v28, %v337_v29 }
  0x66   : > { %v795_v6 = vadd.f32 %v787_v63, %v771_v58  ;;  %v938_v13 = vadd.f32 %v930_v49, %v914_v39  ;;  %v2171_v63 = vld [vmem:[%s1572_s12 + $0x61] sm:$0xff]  ;;  %v668_v49 = vmul.f32 %v2506_v37, %v2116_v47  ;;  %v509_v58 = vadd.f32 %v501_v24, %v485_v48 }
  0x67   : > { %v573_v31 = vmul.f32 %v1680_v41, %v394_v40  ;;  %v652_v39 = vadd.f32 %v644_v10, %v628_v15  ;;  %v835_v30 = vmul.f32 %v1780_v36, %v2095_v21  ;;  %v859_v11 = vmul.f32 %v1785_v5, %v412_v16  ;;  %v2190_v10 = vld [vmem:[%s1547_s15 + $0x71] sm:$0xff] }
  0x68   : > { %v819_v62 = vadd.f32 %v811_v25, %v795_v6  ;;  %v962_v3 = vadd.f32 %v954_v57, %v938_v13  ;;  %v692_v25 = vmul.f32 %v1696_v45, %v2122_v38  ;;  %v533_v32 = vadd.f32 %v525_v43, %v509_v58  ;;  %v2193_v13 = vld [vmem:[%s1604_s28 + $0x70] sm:$0xff] }
  0x69   : > { %v597_v57 = vmul.f32 %v1582_v8, %v2171_v63  ;;  %v716_v24 = vmul.f32 %v1567_v4, %v2119_v61  ;;  %v676_v48 = vadd.f32 %v668_v49, %v652_v39  ;;  %v740_v21 = vmul.f32 %v1750_v17, %v2134_v51  ;;  %v2203_v58 = vld [vmem:[%s1604_s28 + $0x71] sm:$0xff] }
  0x6a   : > { %v986_v6 = vadd.f32 %v978_v44, %v962_v3  ;;  %v843_v16 = vadd.f32 %v835_v30, %v819_v62  ;;  %v883_v44 = vmul.f32 %v1798_v50, %v374_v27  ;;  %v557_v15 = vadd.f32 %v549_v1, %v533_v32 }
  0x6b   : > { %v907_v3 = vmul.f32 %v1803_v35, %v2116_v47  ;;  %v430_v49 = vmul.f32 %v1542_v0, %v2183_v33  ;;  %v700_v39 = vadd.f32 %v692_v25, %v676_v48  ;;  %v454_v62 = vmul.f32 %v1594_v12, %v2193_v13  ;;  %v2220_v25 = vld [vmem:[%s1547_s15 + $0x72] sm:$0xff] }
  0x6c   : > { %v2198_v43 = vadd.f32 %v1002_v19, %v986_v6  ;;  %v867_v4 = vadd.f32 %v859_v11, %v843_v16  ;;  %v478_v27 = vmul.f32 %v2484_v53, %v2190_v10  ;;  %v1053_v19 = vsel %vm1015_vm0, %v1045_v14, 0.0  ;;  %v375_v11 = vld [vmem:[%s1572_s12 + $0x62] sm:$0xff]  ;;  %v2232_v16 = vld [vmem:[%s1572_s12 + $0x70] sm:$0xff] }
  0x6d   : > { %v581_v47 = vadd.f32 %v573_v31, %v557_v15  ;;  %v764_v1 = vmul.f32 %v1626_v22, %v2150_v60  ;;  %v931_v0 = vmul.f32 %v1834_v55, %v2122_v38  ;;  %v724_v30 = vadd.f32 %v716_v24, %v700_v39  ;;  %v413_v53 = vld [vmem:[%s1631_s17 + $0x61] sm:$0xff]  ;;  %v2245_v39 = vld [vmem:[%s1572_s12 + $0x71] sm:$0xff] }
  0x6e   : > { %1019 = vst.msk [vmem:[%s2090_s16 + $0x18] sm:$0xff] %vm1015_vm0, %v2198_v43  ;;  %v891_v12 = vadd.f32 %v883_v44, %v867_v4  ;;  %v462_v6 = vadd.f32 %v454_v62, %v430_v49  ;;  %v502_v14 = vmul.f32 %v1643_v26, %v2203_v58  ;;  %v1026_v31 = vadd.f32 %v2145_v42, %v2129_v46  ;;  %v2240_v42 = vld [vmem:[%s1631_s17 + $0x70] sm:$0xff] }
  0x6f   : > { %v605_v32 = vadd.f32 %v597_v57, %v581_v47  ;;  %v788_v48 = vmul.f32 %v1760_v18, %v337_v29  ;;  %v955_v38 = vmul.f32 %v1839_v56, %v2119_v61  ;;  %v748_v4 = vadd.f32 %v740_v21, %v724_v30 }
  0x70   : > { %v915_v24 = vadd.f32 %v907_v3, %v891_v12  ;;  %v486_v44 = vadd.f32 %v478_v27, %v462_v6  ;;  %v526_v15 = vmul.f32 %v2502_v23, %v2220_v25  ;;  %v812_v26 = vmul.f32 %v1767_v34, %v394_v40 }
  0x71   : > { %v979_v46 = vmul.f32 %v1844_v52, %v2134_v51  ;;  %v621_v29 = vmul.f32 %v1715_v54, %v413_v53  ;;  %v645_v57 = vmul.f32 %v1618_v20, %v375_v11  ;;  %v772_v61 = vadd.f32 %v764_v1, %v748_v4  ;;  %v2512_v4 = vld [vmem:[#allocation11_spill] sm:$0xff] }
  0x72   : > { %v939_v49 = vadd.f32 %v931_v0, %v915_v24  ;;  %v510_v21 = vadd.f32 %v502_v14, %v486_v44  ;;  %v550_v3 = vmul.f32 %v2508_v28, %v2232_v16  ;;  %v1054_v23 = vsel %vm1015_vm0, %v2147_v59, 0.0 }
  0x73   : > { %v1003_v51 = vmul.f32 %v2511_v2, %v2150_v60  ;;  %v629_v40 = vadd.f32 %v621_v29, %v605_v32  ;;  %v669_v62 = vmul.f32 %v2506_v37, %v2183_v33  ;;  %v796_v27 = vadd.f32 %v788_v48, %v772_v61  ;;  %v414_v48 = vld [vmem:[%s1631_s17 + $0x71] sm:$0xff] }
  0x74   : > { %v963_v47 = vadd.f32 %v955_v38, %v939_v49  ;;  %v534_v1 = vadd.f32 %v526_v15, %v510_v21  ;;  %v574_v0 = vmul.f32 %v1680_v41, %v2240_v42  ;;  %v598_v28 = vmul.f32 %v1582_v8, %v2245_v39 }
  0x75   : > { %v653_v30 = vadd.f32 %v645_v57, %v629_v40  ;;  %v693_v59 = vmul.f32 %v1696_v45, %v2193_v13  ;;  %v836_v60 = vmul.f32 %v1780_v36, %v2171_v63  ;;  %v820_v12 = vadd.f32 %v812_v26, %v796_v27 }
  0x76   : > { %v987_v6 = vadd.f32 %v979_v46, %v963_v47  ;;  %v558_v14 = vadd.f32 %v550_v3, %v534_v1  ;;  %v860_v32 = vmul.f32 %v1785_v5, %v413_v53  ;;  %v1027_v41 = vsel %vm1015_vm0, %v2088_v9, 0.0  ;;  %v376_v46 = vld [vmem:[%s1572_s12 + $0x72] sm:$0xff]  ;;  %v329_v9 = vld [vmem:[%s1547_s15 + $0x80] sm:$0xff] }
  0x77   : > { %v1056_v8 = vsel %vm1015_vm0, %v2158_v7, 0.0  ;;  %v677_v38 = vadd.f32 %v669_v62, %v653_v30  ;;  %v717_v24 = vmul.f32 %v2512_v4, %v2190_v10  ;;  %v844_v15 = vadd.f32 %v836_v60, %v820_v12 }
  0x78   : > { %v1011_v44 = vadd.f32 %v1003_v51, %v987_v6  ;;  %v582_v63 = vadd.f32 %v574_v0, %v558_v14  ;;  %v884_v26 = vmul.f32 %v1798_v50, %v375_v11  ;;  %v1055_v53 = vadd.f32 %v1054_v23, %v1053_v19  ;;  %v386_v51 = vld [vmem:[%s1604_s28 + $0x80] sm:$0xff] }
  0x79   : > { %v701_v29 = vadd.f32 %v693_v59, %v677_v38  ;;  %v741_v57 = vmul.f32 %v1750_v17, %v2203_v58  ;;  %v622_v61 = vmul.f32 %v1715_v54, %v414_v48  ;;  %v1028_v7 = vadd.f32 %v1027_v41, %v1026_v31  ;;  %v405_v6 = vld [vmem:[%s1604_s28 + $0x81] sm:$0xff] }
  0x7a   : > { %1020 = vst.msk [vmem:[%s2090_s16 + $0x20] sm:$0xff] %vm1015_vm0, %v1011_v44  ;;  %v606_v49 = vadd.f32 %v598_v28, %v582_v63  ;;  %v868_v21 = vadd.f32 %v860_v32, %v844_v15  ;;  %v908_v3 = vmul.f32 %v1803_v35, %v2183_v33  ;;  %v1048_v11 = vmul.f32 %v2198_v43, %v2198_v43  ;;  %v348_v28 = vld [vmem:[%s1547_s15 + $0x81] sm:$0xff] }
  0x7b   : > { %v725_v19 = vadd.f32 %v717_v24, %v701_v29  ;;  %v765_v23 = vmul.f32 %v1626_v22, %v2220_v25  ;;  %v646_v40 = vmul.f32 %v1618_v20, %v376_v46  ;;  %v932_v31 = vmul.f32 %v1834_v55, %v2193_v13  ;;  %v367_v38 = vld [vmem:[%s1547_s15 + $0x82] sm:$0xff] }
  0x7c   : > { %v892_v54 = vadd.f32 %v884_v26, %v868_v21  ;;  %v630_v62 = vadd.f32 %v622_v61, %v606_v49  ;;  %v670_v27 = vmul.f32 %v2506_v37, %v329_v9  ;;  %v1057_v47 = vadd.f32 %v1056_v8, %v1055_v53  ;;  %v396_v49 = vld [vmem:[%s1631_s17 + $0x80] sm:$0xff] }
  0x7d   : > { %v1029_v33 = vsel %vm1015_vm0, %v2198_v43, 0.0  ;;  %v749_v1 = vadd.f32 %v741_v57, %v725_v19  ;;  %v789_v0 = vmul.f32 %v1760_v18, %v2232_v16  ;;  %v956_v20 = vmul.f32 %v1839_v56, %v2190_v10 }
  0x7e   : > { %v916_v30 = vadd.f32 %v908_v3, %v892_v54  ;;  %v654_v59 = vadd.f32 %v646_v40, %v630_v62  ;;  %v694_v13 = vmul.f32 %v1696_v45, %v386_v51  ;;  %v1058_v60 = vsel %vm1015_vm0, %v1048_v11, 0.0 }
  0x7f   : > { %v773_v37 = vadd.f32 %v765_v23, %v749_v1  ;;  %v813_v12 = vmul.f32 %v1767_v34, %v2240_v42  ;;  %v980_v43 = vmul.f32 %v1844_v52, %v2203_v58  ;;  %v1049_v16 = vmul.f32 %v1011_v44, %v1011_v44  ;;  %v358_v23 = vld [vmem:[%s1572_s12 + $0x81] sm:$0xff] }
  0x80   : > { %v940_v14 = vadd.f32 %v932_v31, %v916_v30  ;;  %v678_v32 = vadd.f32 %v670_v27, %v654_v59  ;;  %v718_v41 = vmul.f32 %v2512_v4, %v348_v28  ;;  %v1030_v10 = vadd.f32 %v1029_v33, %v1028_v7  ;;  %v339_v4 = vld [vmem:[%s1572_s12 + $0x80] sm:$0xff] }
  0x81   : > { %v797_v8 = vadd.f32 %v789_v0, %v773_v37  ;;  %v1004_v45 = vmul.f32 %v2511_v2, %v2220_v25  ;;  %v837_v42 = vmul.f32 %v1780_v36, %v2245_v39  ;;  %v1031_v24 = vsel %vm1015_vm0, %v1011_v44, 0.0  ;;  %v377_v59 = vld [vmem:[%s1572_s12 + $0x82] sm:$0xff]  ;;  %v330_v37 = vld [vmem:[%s1547_s15 + $0x90] sm:$0xff]  ;;  %s1097_s12 = sshll.u32 %s2090_s16, 4  ;;  %s2351_s12 = int_to_ptr.vmem [resolvable:$true] %s1097_s12 }
  0x82   : > { %v964_v58 = vadd.f32 %v956_v20, %v940_v14  ;;  %v702_v63 = vadd.f32 %v694_v13, %v678_v32  ;;  %v742_v15 = vmul.f32 %v1750_v17, %v405_v6  ;;  %v1059_v26 = vadd.f32 %v1058_v60, %v1057_v47  ;;  %v387_v14 = vld [vmem:[%s1604_s28 + $0x90] sm:$0xff]  ;;  %s1354_s10 = scalar_lea.vmem %s2351_s12, 1024  ;;  %p1361_p0 = scmp.lt.s32.totalorder %s2351_s12, %s1359_s26 }
  0x83   : > { %v821_v53 = vadd.f32 %v813_v12, %v797_v8  ;;  %v861_v29 = vmul.f32 %v1785_v5, %v414_v48  ;;  %v1060_v25 = vsel %vm1015_vm0, %v1049_v16, 0.0  ;;  %v766_v7 = vmul.f32 %v1626_v22, %v367_v38  ;;  %p1355_p11 = scmp.ne.s32.totalorder %s2351_s12, %s1354_s10  ;;  %p1362_p1 = scmp.lt.s32.totalorder %s1360_s29, %s1354_s10 }
  0x84   : > { %v988_v57 = vadd.f32 %v980_v43, %v964_v58  ;;  %v726_v61 = vadd.f32 %v718_v41, %v702_v63  ;;  %v1032_v39 = vadd.f32 %v1031_v24, %v1030_v10  ;;  %v885_v21 = vmul.f32 %v1798_v50, %v376_v46  ;;  %v368_v58 = vld [vmem:[%s1547_s15 + $0x92] sm:$0xff] }
  0x85   : > { %v845_v44 = vadd.f32 %v837_v42, %v821_v53  ;;  %v790_v11 = vmul.f32 %v1760_v18, %v339_v4  ;;  %v1061_v19 = vadd.f32 %v1060_v25, %v1059_v26  ;;  %v909_v40 = vmul.f32 %v1803_v35, %v329_v9  ;;  %v415_v18 = vld [vmem:[%s1631_s17 + $0x81] sm:$0xff]  ;;  %p1356_p12 = pnand %p1355_p11, %p1527_p5  ;;  %p1363_p2 = por %p1362_p1, %p1361_p0 }
  0x86   : > { %v1012_v17 = vadd.f32 %v1004_v45, %v988_v57  ;;  %v750_v3 = vadd.f32 %v742_v15, %v726_v61  ;;  %v814_v62 = vmul.f32 %v1767_v34, %v396_v49  ;;  %v933_v47 = vmul.f32 %v1834_v55, %v386_v51  ;;  %v406_v45 = vld [vmem:[%s1604_s28 + $0x91] sm:$0xff]  ;;  %s1306_s28 = sshll.u32 %s1510_s25, 10 }
  0x87   : > { %v869_v48 = vadd.f32 %v861_v29, %v845_v44  ;;  %v838_v9 = vmul.f32 %v1780_v36, %v358_v23  ;;  %v957_v20 = vmul.f32 %v1839_v56, %v348_v28  ;;  %v862_v34 = vmul.f32 %v1785_v5, %v415_v18  ;;  %v349_v5 = vld [vmem:[%s1547_s15 + $0x91] sm:$0xff]  ;;  %s2356_s15 = scalar_lea.hbm %s2439_s5, %s1306_s28  ;;  %p1357_p13 = pneg %p1356_p12 }
  0x88   : > { %1021 = vst.msk [vmem:[%s2090_s16 + $0x28] sm:$0xff] %vm1015_vm0, %v1012_v17  ;;  %v1033_v22 = vsel %vm1015_vm0, %v1012_v17, 0.0  ;;  %v1050_v54 = vmul.f32 %v1012_v17, %v1012_v17  ;;  %v774_v31 = vadd.f32 %v766_v7, %v750_v3  ;;  %v981_v51 = vmul.f32 %v1844_v52, %v405_v6 }
  0x89   : > { %v1034_v46 = vadd.f32 %v1033_v22, %v1032_v39  ;;  %v893_v27 = vadd.f32 %v885_v21, %v869_v48  ;;  %v886_v43 = vmul.f32 %v1798_v50, %v377_v59  ;;  %v1005_v36 = vmul.f32 %v2511_v2, %v367_v38  ;;  %p1364_p3 = pnand %p1363_p2, %p1357_p13 }
  0x8a   : > { %v1062_v33 = vsel %vm1015_vm0, %v1050_v54, 0.0  ;;  %v798_v1 = vadd.f32 %v790_v11, %v774_v31  ;;  %v910_v28 = vmul.f32 %v1803_v35, %v330_v37  ;;  %v934_v8 = vmul.f32 %v1834_v55, %v387_v14 }
  0x8b   : > { %v1063_v0 = vadd.f32 %v1062_v33, %v1061_v19  ;;  %v917_v30 = vadd.f32 %v909_v40, %v893_v27  ;;  %v958_v50 = vmul.f32 %v1839_v56, %v349_v5  ;;  %v982_v15 = vmul.f32 %v1844_v52, %v406_v45 }
  0x8c   : > { %v822_v13 = vadd.f32 %v814_v62, %v798_v1  ;;  %v1006_v56 = vmul.f32 %v2511_v2, %v368_v58 }
  0x8d   : > { %v941_v60 = vadd.f32 %v933_v47, %v917_v30 }
  0x8e   : > { %v846_v12 = vadd.f32 %v838_v9, %v822_v13 }
  0x8f   : > { %v965_v16 = vadd.f32 %v957_v20, %v941_v60 }
  0x90   : > { %v870_v32 = vadd.f32 %v862_v34, %v846_v12 }
  0x91   : > { %v989_v41 = vadd.f32 %v981_v51, %v965_v16 }
  0x92   : > { %v894_v10 = vadd.f32 %v886_v43, %v870_v32 }
  0x93   : > { %v1013_v6 = vadd.f32 %v1005_v36, %v989_v41 }
  0x94   : > { %v918_v42 = vadd.f32 %v910_v28, %v894_v10 }
  0x95   : > { %1022 = vst.msk [vmem:[%s2090_s16 + $0x30] sm:$0xff] %vm1015_vm0, %v1013_v6  ;;  %v1035_v38 = vsel %vm1015_vm0, %v1013_v6, 0.0  ;;  %v1051_v24 = vmul.f32 %v1013_v6, %v1013_v6 }
  0x96   : > { %v1036_v35 = vadd.f32 %v1035_v38, %v1034_v46  ;;  %v942_v63 = vadd.f32 %v934_v8, %v918_v42 }
  0x97   : > { %v1064_v55 = vsel %vm1015_vm0, %v1051_v24, 0.0 }
  0x98   : > { %v1065_v26 = vadd.f32 %v1064_v55, %v1063_v0  ;;  %v966_v53 = vadd.f32 %v958_v50, %v942_v63 }
  0x9a   : > { %v990_v4 = vadd.f32 %v982_v15, %v966_v53 }
  0x9c   : > { %v1014_v52 = vadd.f32 %v1006_v56, %v990_v4 }
  0x9e   : > { %1023 = vst.msk [vmem:[%s2090_s16 + $0x38] sm:$0xff] %vm1015_vm0, %v1014_v52  ;;  %v1037_v29 = vsel %vm1015_vm0, %v1014_v52, 0.0  ;;  %v1052_v25 = vmul.f32 %v1014_v52, %v1014_v52 }
  0x9f   : > { %v1038_v57 = vadd.f32 %v1037_v29, %v1036_v35 }
  0xa0   : > { %1367 = shalt.err (!%p1364_p3)
}
  0xa1   : > { %s1368_s9 = scalar_lea.hbm %s2356_s15, 1024  ;;  %s1372_s16 = scalar_lea.hbm %s2439_s5, 2048 }
  0xa2   : > { %p1369_p4 = scmp.ne.s32.totalorder %s2356_s15, %s1368_s9  ;;  %p1373_p9 = scmp.lt.u32.totalorder %s2356_s15, %s2439_s5 }
  0xa3   : > { %p1374_p10 = scmp.lt.u32.totalorder %s1372_s16, %s1368_s9  ;;  %p1376_p12 = scmp.lt.u32.totalorder %s1368_s9, %s2356_s15 }
  0xa4   : > { %p1370_p7 = pnand %p1369_p4, %p1527_p5 }
  0xa5   : > { %p1375_p11 = por %p1374_p10, %p1373_p9 }
  0xa6   : > { %p1371_p8 = pneg %p1370_p7 }
  0xa7   : > { %p1377_p13 = por %p1376_p12, %p1375_p11 }
  0xa9   : > { %p1378_p0 = pnand %p1377_p13, %p1371_p8 }
  0xab   : > { %1381 = shalt.err (!%p1378_p0)
}
  0xac   : > { %s1451_s18 = smov 128   ;;  %s1452_s10 = smov 8   ;;  %v1066_v2 = vsel %vm1015_vm0, %v1052_v25, 0.0  ;;  %v1039_v61 = vrot.slane %v1038_v57, 4  ;;  %vm1074_vm1 = vcmask 1040384   ;;  %vm1076_vm2 = vcmask 779264  }
  0xad   : > { %1308 = dma.vmem_to_hbm [thread:$0]  (%p1527_p5), %s2351_s12, 1024, %s2356_s15, %s1079_s19, %s1451_s18, %s1451_s18, %s1452_s10   ;;  %v1067_v7 = vadd.f32 %v1066_v2, %v1065_v26 }
  0xae   : > { %v1040_v39 = vadd.f32 %v1039_v61, %v1038_v57  ;;  %s1245_s20 = sshll.u32 %s2060_s13, 1  ;;  %s1303_s12 = sshll.u32 %s1510_s25, 5 }
  0xaf   : > { %v1068_v49 = vrot.slane %v1067_v7, 4  ;;  %s300_s26 = scalar_lea.vmem [#allocation4], %s1245_s20  ;;  %s2393_s9 = scalar_lea.hbm %s2440_s6, %s1303_s12 }
  0xb0   : > { %v1041_v44 = vrot.slane %v1040_v39, 2  ;;  %s1113_s29 = sshll.u32 %s300_s26, 4  ;;  %s1084_s11 = scalar_lea.sflag [#allocation5], %s2060_s13  ;;  %s2388_s29 = int_to_ptr.vmem [resolvable:$true] %s1113_s29 }
  0xb1   : > { %v1069_v21 = vadd.f32 %v1068_v49, %v1067_v7  ;;  %s1382_s14 = scalar_lea.vmem %s2388_s29, 32  ;;  %s1453_s25 = smov [#allocation4]  }
  0xb2   : > { %v1042_v17 = vadd.f32 %v1041_v44, %v1040_v39  ;;  %p1383_p1 = scmp.ne.s32.totalorder %s2388_s29, %s1382_s14  ;;  %s1386_s16 = sshll.u32 %s1453_s25, 4  ;;  %s1387_s16 = int_to_ptr.vmem [resolvable:$false] %s1386_s16 }
  0xb3   : > { %v1070_v3 = vrot.slane %v1069_v21, 2  ;;  %s1388_s28 = scalar_lea.vmem %s1387_s16, 64  ;;  %p1389_p4 = scmp.lt.s32.totalorder %s2388_s29, %s1387_s16 }
  0xb4   : > { %v1043_v11 = vrot.slane %v1042_v17, 1  ;;  %p1384_p2 = pnand %p1383_p1, %p1527_p5  ;;  %p1390_p7 = scmp.lt.s32.totalorder %s1388_s28, %s1382_s14 }
  0xb5   : > { %v1071_v19 = vadd.f32 %v1070_v3, %v1069_v21 }
  0xb6   : > { %v1044_v23 = vadd.f32 %v1043_v11, %v1042_v17  ;;  %p1385_p3 = pneg %p1384_p2  ;;  %p1391_p8 = por %p1390_p7, %p1389_p4 }
  0xb7   : > { %v1072_v48 = vrot.slane %v1071_v19, 1 }
  0xb8   : > { %p1392_p9 = pnand %p1391_p8, %p1385_p3 }
  0xb9   : > { %v1073_v40 = vadd.f32 %v1072_v48, %v1071_v19 }
  0xbb   : > { %v1075_v22 = vsel %vm1074_vm1, %v1044_v23, %v1073_v40 }
  0xbc   : > { %1077 = vst.msk [vmem:[%s300_s26] sm:$0x3] %vm1076_vm2, %v1075_v22 }
  0xbd   : > { %1395 = shalt.err (!%p1392_p9)
}
  0xbe   : > { %s1396_s13 = scalar_lea.hbm %s2393_s9, 32  ;;  %s1400_s10 = scalar_lea.hbm %s2440_s6, 64 }
  0xbf   : > { %p1397_p10 = scmp.ne.s32.totalorder %s2393_s9, %s1396_s13  ;;  %p1401_p13 = scmp.lt.u32.totalorder %s2393_s9, %s2440_s6 }
  0xc0   : > { %p1402_p0 = scmp.lt.u32.totalorder %s1400_s10, %s1396_s13  ;;  %p1404_p2 = scmp.lt.u32.totalorder %s1396_s13, %s2393_s9 }
  0xc1   : > { %p1398_p11 = pnand %p1397_p10, %p1527_p5 }
  0xc2   : > { %p1403_p1 = por %p1402_p0, %p1401_p13 }
  0xc3   : > { %p1399_p12 = pneg %p1398_p11 }
  0xc4   : > { %p1405_p3 = por %p1404_p2, %p1403_p1 }
  0xc6   : > { %p1406_p4 = pnand %p1405_p3, %p1399_p12 }
  0xc8   : > { %1409 = shalt.err (!%p1406_p4)
}
  0xc9   : > { %1309 = dma.vmem_to_hbm [thread:$0]  (%p1527_p5), %s2388_s29, 32, %s2393_s9, %s1084_s11  }
  0xca PF: > { %p1319_p7 = scmp.ge.s32.totalorder %s1448_s24, 2  ;;  %s1125_s12 = sand.u32 1, %s1436_s21  }
  0xcb   : > { %s1126_s15 = scalar_lea.sflag [#allocation3], %s1125_s12 }
  0xcc   : > { %p1313_p8 = pnand %p1319_p7, %p1531_p6 }
  0xce   : > { %1427 = dma.done.wait (!%p1313_p8), %s1126_s15, 1024  }
  0xcf   : > { %1429 = vsyncadd (!%p1313_p8), %s1126_s15, 4294966272  ;;  %s1135_s19 = scalar_lea.sflag [#allocation5], %s1125_s12 }
  0xd0   : > { %1431 = dma.done.wait (!%p1313_p8), %s1135_s19, 32  }
  0xd1   : > { %1433 = vsyncadd (!%p1313_p8), %s1135_s19, 4294967264  ;;  %p20_p5 = scmp.ge.s32.totalorder %s1514_s27, 4   ;;  %s2513_s21 = smov %s1440_s22 }
  0xd2   : > { %s2514_s22 = smov %s1444_s23  ;;  %s2515_s23 = smov %s1525_s30 }
  0xd3   : > { %s2516_s24 = smov %s1514_s27  ;;  %22 = sbr.rel (!%p20_p5) target bundleno = 5 (0x5), region = 125 }
  0xda   :  { %1140 = vsyncpa [#allocation3], 1 }
  0xdb   :  { %1142 = vsyncpa [#allocation3 + $0x1], 1 }
  0xdc   :  { %1143 = vsyncpa [#allocation5], 1 }
  0xdd   :  { %1145 = vsyncpa [#allocation5 + $0x1], 1 }

</bundles_post_ra>
